<compile_context>
chip_gen: v6e
topology: v6e:2x2x1
jax: 0.10.0
libtpu: 0.0.40
codegen_flags: <defaults>
</compile_context>

<pallas_src>
import functools
import math

import jax
import jax.numpy as jnp
from jax.experimental import pallas as pl
from jax.experimental.pallas import tpu as pltpu


# ----------------------------------------------------------------------------
# helpers
# ----------------------------------------------------------------------------
_DN_TRANS_B = (((1,), (1,)), ((), ()))   # contract last dim of both operands (A @ B.T)
_LN_EPS = 1e-5                           # torch.nn.LayerNorm default


def _layernorm(x, g, b):
    mu = jnp.mean(x, axis=-1, keepdims=True)
    xc = x - mu
    var = jnp.mean(xc * xc, axis=-1, keepdims=True)
    return xc * jax.lax.rsqrt(var + _LN_EPS) * g + b


def _full_spec(shape):
    zeros = (0,) * len(shape)
    return pl.BlockSpec(shape, lambda i, _z=zeros: _z)


def _row_spec(shape):
    return pl.BlockSpec(shape, lambda i: (i, 0, 0))


# ----------------------------------------------------------------------------
# Kernel 1: fused attention sub-layer (per batch element)
#   out = LayerNorm1( MultiHeadAttention(xq, xkv, xkv, mask) + xq )
# ----------------------------------------------------------------------------
def _mha_ln_kernel(xq_ref, xkv_ref, mask_ref, wq_ref, wk_ref, wv_ref, wot_ref,
                   bo_ref, g_ref, b_ref, o_ref, *, num_heads, scale):
    f32 = jnp.float32
    xq = xq_ref[0].astype(f32)        # (Sq, D)
    xkv = xkv_ref[0].astype(f32)      # (Skv, D)
    mask = mask_ref[0]                # (Sq, Skv), 0 => masked

    D = xq.shape[-1]
    dk = D // num_heads
    xqs = xq * scale                  # fold 1/sqrt(d_k) into q once

    acc = jnp.zeros((xq.shape[0], D), f32)
    for h in range(num_heads):        # static unroll; all slices are aligned sublanes
        rows = slice(h * dk, (h + 1) * dk)
        q_h = jax.lax.dot_general(xqs, wq_ref[rows, :], _DN_TRANS_B,
                                  preferred_element_type=f32)          # (Sq, dk)
        k_h = jax.lax.dot_general(xkv, wk_ref[rows, :], _DN_TRANS_B,
                                  preferred_element_type=f32)          # (Skv, dk)
        v_h = jax.lax.dot_general(xkv, wv_ref[rows, :], _DN_TRANS_B,
                                  preferred_element_type=f32)          # (Skv, dk)

        s = jax.lax.dot_general(q_h, k_h, _DN_TRANS_B,
                                preferred_element_type=f32)            # (Sq, Skv)
        s = jnp.where(mask == 0.0, -1e9, s)
        s = s - jnp.max(s, axis=-1, keepdims=True)
        e = jnp.exp(s)
        p = e * pl.reciprocal(jnp.sum(e, axis=-1, keepdims=True), approx=True)

        ctx_h = jnp.dot(p, v_h, preferred_element_type=f32)            # (Sq, dk)
        # fc_out contribution of this head: ctx_h @ W_out[:, h*dk:(h+1)*dk].T
        # (wot_ref holds W_out pre-transposed, so this is an aligned row slice)
        acc = acc + jnp.dot(ctx_h, wot_ref[rows, :], preferred_element_type=f32)

    attn_out = acc + bo_ref[...]      # (1, D) bias broadcast
    y = attn_out + xq                 # residual with the query input
    o_ref[0] = _layernorm(y, g_ref[...], b_ref[...]).astype(o_ref.dtype)


def attention_sublayer(xq, xkv, mask, ap, num_heads):
    """LayerNorm1(MHA(xq, xkv, xkv, mask) + xq), fully fused per batch element."""
    B, Sq, D = xq.shape
    Skv = xkv.shape[1]
    scale = 1.0 / math.sqrt(D // num_heads)
    kernel = functools.partial(_mha_ln_kernel, num_heads=num_heads, scale=scale)
    return pl.pallas_call(
        kernel,
        out_shape=jax.ShapeDtypeStruct((B, Sq, D), xq.dtype),
        grid=(B,),
        in_specs=[
            _row_spec((1, Sq, D)),        # xq
            _row_spec((1, Skv, D)),       # xkv
            _row_spec((1, Sq, Skv)),      # mask
            _full_spec((D, D)),           # wq  (out, in)  -> trans-B matmul
            _full_spec((D, D)),           # wk
            _full_spec((D, D)),           # wv
            _full_spec((D, D)),           # fc_out weight pre-transposed (in, out)
            _full_spec((1, D)),           # fc_out bias
            _full_spec((1, D)),           # layer_norm1 gamma
            _full_spec((1, D)),           # layer_norm1 beta
        ],
        out_specs=_row_spec((1, Sq, D)),
        compiler_params=pltpu.CompilerParams(dimension_semantics=("parallel",)),
    )(xq, xkv, mask,
      ap["wq"], ap["wk"], ap["wv"], ap["wo_t"],
      ap["bo"].reshape(1, D), ap["ln1_g"].reshape(1, D), ap["ln1_b"].reshape(1, D))


# ----------------------------------------------------------------------------
# Kernel 2: fused feed-forward sub-layer (per batch element)
#   out = LayerNorm2( fc2(relu(fc1(LayerNorm_ff(x)))) + x )
# ----------------------------------------------------------------------------
def _ffn_ln_kernel(x_ref, gf_ref, bf_ref, w1_ref, b1_ref, w2_ref, b2_ref,
                   g2_ref, bt2_ref, o_ref):
    f32 = jnp.float32
    x = x_ref[0].astype(f32)                                  # (S, D)
    h = _layernorm(x, gf_ref[...], bf_ref[...])
    h1 = jax.lax.dot_general(h, w1_ref[...], _DN_TRANS_B,
                             preferred_element_type=f32) + b1_ref[...]
    h1 = jnp.maximum(h1, 0.0)                                 # ReLU
    h2 = jax.lax.dot_general(h1, w2_ref[...], _DN_TRANS_B,
                             preferred_element_type=f32) + b2_ref[...]
    y = h2 + x                                                # residual
    o_ref[0] = _layernorm(y, g2_ref[...], bt2_ref[...]).astype(o_ref.dtype)


def ffn_sublayer(x, fp):
    B, S, D = x.shape
    d_ff = fp["w1"].shape[0]
    return pl.pallas_call(
        _ffn_ln_kernel,
        out_shape=jax.ShapeDtypeStruct((B, S, D), x.dtype),
        grid=(B,),
        in_specs=[
            _row_spec((1, S, D)),
            _full_spec((1, D)), _full_spec((1, D)),           # FeedForward LayerNorm
            _full_spec((d_ff, D)), _full_spec((1, d_ff)),     # fc1
            _full_spec((D, d_ff)), _full_spec((1, D)),        # fc2
            _full_spec((1, D)), _full_spec((1, D)),           # layer_norm2
        ],
        out_specs=_row_spec((1, S, D)),
        compiler_params=pltpu.CompilerParams(dimension_semantics=("parallel",)),
    )(x,
      fp["lnf_g"].reshape(1, D), fp["lnf_b"].reshape(1, D),
      fp["w1"], fp["b1"].reshape(1, d_ff),
      fp["w2"], fp["b2"].reshape(1, D),
      fp["ln2_g"].reshape(1, D), fp["ln2_b"].reshape(1, D))


# ----------------------------------------------------------------------------
# Kernel 3: generator = linear + log_softmax (per batch element)
# ----------------------------------------------------------------------------
def _generator_kernel(x_ref, wg_ref, bg_ref, o_ref):
    f32 = jnp.float32
    x = x_ref[0].astype(f32)
    logits = jax.lax.dot_general(x, wg_ref[...], _DN_TRANS_B,
                                 preferred_element_type=f32) + bg_ref[...]
    z = logits - jnp.max(logits, axis=-1, keepdims=True)
    lse = jnp.log(jnp.sum(jnp.exp(z), axis=-1, keepdims=True))
    o_ref[0] = (z - lse).astype(o_ref.dtype)


def generator(x, gp):
    B, S, D = x.shape
    V = gp["wg"].shape[0]
    return pl.pallas_call(
        _generator_kernel,
        out_shape=jax.ShapeDtypeStruct((B, S, V), x.dtype),
        grid=(B,),
        in_specs=[_row_spec((1, S, D)), _full_spec((V, D)), _full_spec((1, V))],
        out_specs=_row_spec((1, S, V)),
        compiler_params=pltpu.CompilerParams(dimension_semantics=("parallel",)),
    )(x, gp["wg"], gp["bg"].reshape(1, V))


# ----------------------------------------------------------------------------
# Model wrapper (mirrors SelfTransformer.forward)
# ----------------------------------------------------------------------------
def sublayer_forward(xq, xkv, mask, sp, num_heads):
    a = attention_sublayer(xq, xkv, mask, sp["attn"], num_heads)
    return ffn_sublayer(a, sp["ff"])


def self_transformer_forward(params, src, tgt, src_mask, tgt_mask, *, num_heads):
    d_model = params["embed"].shape[1]
    pe = params["pe"]

    def embed(tokens):
        # word_embed(x) = E[x]*sqrt(d); forward multiplies by sqrt(d) again,
        # then adds position_embed(that) = that + pe  =>  2*E[x]*d + pe
        # TODO(synk): embedding gather stays in plain JAX (jnp.take), not a Pallas kernel.
        e = jnp.take(params["embed"], tokens, axis=0) * float(d_model)
        return 2.0 * e + pe[None, : tokens.shape[1], :]

    B, S_src = src.shape
    S_tgt = tgt.shape[1]
    f32 = jnp.float32
    src_self_mask = jnp.broadcast_to(src_mask, (B, S_src, S_src)).astype(f32)
    tgt_self_mask = jnp.broadcast_to(tgt_mask, (B, S_tgt, S_tgt)).astype(f32)
    cross_mask = jnp.broadcast_to(src_mask, (B, S_tgt, S_src)).astype(f32)

    x = embed(src).astype(f32)
    for sp in params["encoder"]:
        x = sublayer_forward(x, x, src_self_mask, sp, num_heads)
    memory = x

    y = embed(tgt).astype(f32)
    for dp in params["decoder"]:
        y = sublayer_forward(y, y, tgt_self_mask, dp["self"], num_heads)
        y = sublayer_forward(y, memory, cross_mask, dp["cross"], num_heads)

    return generator(y, params["gen"])


# ----------------------------------------------------------------------------
# Parameter construction
# ----------------------------------------------------------------------------
def _uniform(key, shape, bound):
    return jax.random.uniform(key, shape, jnp.float32, -bound, bound)


def make_positional_encoding(max_len, d_model):
    pos = jnp.arange(max_len, dtype=jnp.float32)[:, None]
    div = jnp.exp(jnp.arange(0, d_model, 2, dtype=jnp.float32)
                  * (-math.log(10000.0) / d_model))
    ang = pos * div
    pe = jnp.zeros((max_len, d_model), jnp.float32)
    pe = pe.at[:, 0::2].set(jnp.sin(ang))
    pe = pe.at[:, 1::2].set(jnp.cos(ang))
    return pe


def init_attn_params(key, d_model):
    ks = jax.random.split(key, 7)
    bd = 1.0 / math.sqrt(d_model)
    return {
        "wq": _uniform(ks[0], (d_model, d_model), bd),
        "wk": _uniform(ks[1], (d_model, d_model), bd),
        "wv": _uniform(ks[2], (d_model, d_model), bd),
        # fc_out weight stored pre-transposed (d_in, d_out): per-head slices are
        # aligned sublane ranges and no transpose is needed anywhere.
        "wo_t": _uniform(ks[3], (d_model, d_model), bd),
        "bo": _uniform(ks[4], (d_model,), bd),
        "ln1_g": 1.0 + _uniform(ks[5], (d_model,), 0.1),
        "ln1_b": _uniform(ks[6], (d_model,), 0.1),
    }


def init_ff_params(key, d_model, d_ff):
    ks = jax.random.split(key, 8)
    b1 = 1.0 / math.sqrt(d_model)
    b2 = 1.0 / math.sqrt(d_ff)
    return {
        "lnf_g": 1.0 + _uniform(ks[0], (d_model,), 0.1),
        "lnf_b": _uniform(ks[1], (d_model,), 0.1),
        "w1": _uniform(ks[2], (d_ff, d_model), b1),
        "b1": _uniform(ks[3], (d_ff,), b1),
        "w2": _uniform(ks[4], (d_model, d_ff), b2),
        "b2": _uniform(ks[5], (d_model,), b2),
        "ln2_g": 1.0 + _uniform(ks[6], (d_model,), 0.1),
        "ln2_b": _uniform(ks[7], (d_model,), 0.1),
    }


def init_sublayer(key, d_model, d_ff):
    k1, k2 = jax.random.split(key)
    return {"attn": init_attn_params(k1, d_model),
            "ff": init_ff_params(k2, d_model, d_ff)}


def init_params(key, vocab_size, d_model, d_ff, num_layers=6, max_len=64):
    k_embed, k_enc, k_dec, k_gen = jax.random.split(key, 4)
    # small embedding init so that 2*E*d_model stays O(1) (keeps softmax well-conditioned)
    embed = jax.random.normal(k_embed, (vocab_size, d_model), jnp.float32) * (0.5 / d_model)
    enc_keys = jax.random.split(k_enc, num_layers)
    dec_keys = jax.random.split(k_dec, num_layers)
    kg1, kg2 = jax.random.split(k_gen)
    bd = 1.0 / math.sqrt(d_model)
    return {
        "embed": embed,
        "pe": make_positional_encoding(max_len, d_model),
        "encoder": [init_sublayer(k, d_model, d_ff) for k in enc_keys],
        "decoder": [{"self": init_sublayer(k1, d_model, d_ff),
                     "cross": init_sublayer(k2, d_model, d_ff)}
                    for k1, k2 in (jax.random.split(k, 2) for k in dec_keys)],
        "gen": {"wg": _uniform(kg1, (vocab_size, d_model), bd),
                "bg": _uniform(kg2, (vocab_size,), bd)},
    }


# ----------------------------------------------------------------------------
# Pure-JAX reference (for a correctness sanity check)
# ----------------------------------------------------------------------------
def _reference_forward(params, src, tgt, src_mask, tgt_mask, num_heads):
    d_model = params["embed"].shape[1]

    def layernorm(x, g, b):
        mu = x.mean(-1, keepdims=True)
        var = ((x - mu) ** 2).mean(-1, keepdims=True)
        return (x - mu) / jnp.sqrt(var + _LN_EPS) * g + b

    def mha(xq, xkv, mask, ap):
        B, Sq, D = xq.shape
        dk = D // num_heads
        q = xq @ ap["wq"].T
        k = xkv @ ap["wk"].T
        v = xkv @ ap["wv"].T
        sh = lambda t: t.reshape(B, -1, num_heads, dk).transpose(0, 2, 1, 3)
        q, k, v = sh(q), sh(k), sh(v)
        s = jnp.einsum("bhqd,bhkd->bhqk", q, k) / math.sqrt(dk)
        s = jnp.where(mask[:, None, :, :] == 0, -1e9, s)
        p = jax.nn.softmax(s, axis=-1)
        ctx = jnp.einsum("bhqk,bhkd->bhqd", p, v)
        ctx = ctx.transpose(0, 2, 1, 3).reshape(B, Sq, D)
        return ctx @ ap["wo_t"] + ap["bo"]

    def sublayer(xq, xkv, mask, sp):
        ap, f = sp["attn"], sp["ff"]
        a = layernorm(mha(xq, xkv, mask, ap) + xq, ap["ln1_g"], ap["ln1_b"])
        h = layernorm(a, f["lnf_g"], f["lnf_b"])
        h = jnp.maximum(h @ f["w1"].T + f["b1"], 0.0)
        h = h @ f["w2"].T + f["b2"]
        return layernorm(h + a, f["ln2_g"], f["ln2_b"])

    def embed(tok):
        e = jnp.take(params["embed"], tok, axis=0) * float(d_model)
        return 2.0 * e + params["pe"][None, : tok.shape[1], :]

    B, S_src = src.shape
    S_tgt = tgt.shape[1]
    src_m = jnp.broadcast_to(src_mask, (B, S_src, S_src))
    tgt_m = jnp.broadcast_to(tgt_mask, (B, S_tgt, S_tgt))
    cross_m = jnp.broadcast_to(src_mask, (B, S_tgt, S_src))

    x = embed(src)
    for sp in params["encoder"]:
        x = sublayer(x, x, src_m, sp)
    memory = x
    y = embed(tgt)
    for dp in params["decoder"]:
        y = sublayer(y, y, tgt_m, dp["self"])
        y = sublayer(y, memory, cross_m, dp["cross"])
    logits = y @ params["gen"]["wg"].T + params["gen"]["bg"]
    return jax.nn.log_softmax(logits, axis=-1)


# ----------------------------------------------------------------------------
if __name__ == "__main__":
    vocab_size, d_model, d_ff, num_heads = 128, 128, 256, 4
    batch, src_len, tgt_len = 2, 8, 8

    root = jax.random.PRNGKey(0)
    kp, ks, kt = jax.random.split(root, 3)
    params = init_params(kp, vocab_size, d_model, d_ff)

    src = jax.random.randint(ks, (batch, src_len), 0, vocab_size)
    tgt = jax.random.randint(kt, (batch, tgt_len), 0, vocab_size)

    # src padding mask (B, 1, S_src): batch element 1 has its last two keys masked.
    src_mask = jnp.ones((batch, 1, src_len), jnp.float32)
    src_mask = src_mask.at[1, 0, src_len - 2:].set(0.0)
    # causal target mask (B, S_tgt, S_tgt)
    causal = jnp.tril(jnp.ones((tgt_len, tgt_len), jnp.float32))
    tgt_mask = jnp.broadcast_to(causal[None], (batch, tgt_len, tgt_len))

    fwd = jax.jit(functools.partial(self_transformer_forward, num_heads=num_heads))
    out = jax.block_until_ready(fwd(params, src, tgt, src_mask, tgt_mask))

    ref = _reference_forward(params, src, tgt, src_mask, tgt_mask, num_heads)
    assert out.shape == (batch, tgt_len, vocab_size)
    assert bool(jnp.isfinite(out).all())
    # loose-ish tolerance: softmax denominator uses the EUP approximate reciprocal.
    assert jnp.allclose(out, ref, atol=2e-2, rtol=2e-2), float(jnp.max(jnp.abs(out - ref)))

    print("KERNEL_OK")
</pallas_src>

<mosaic_0001>
module attributes {stable_mosaic.version = 11 : i64} {
  func.func @_generator_kernel(%arg0: i32, %arg1: memref<1x8x128xf32, #tpu.memory_space<vmem>>, %arg2: memref<128x128xf32, #tpu.memory_space<vmem>>, %arg3: memref<1x128xf32, #tpu.memory_space<vmem>>, %arg4: memref<1x8x128xf32, #tpu.memory_space<vmem>>) attributes {dimension_semantics = [#tpu.dimension_semantics<parallel>], iteration_bounds = array<i64: 2>, scalar_prefetch = 0 : i64, scratch_operands = 0 : i64, tpu.core_type = #tpu.core_type<tc>, window_params = [{transform_indices = @transform_0, window_bounds = array<i64: 1, 8, 128>}, {pipeline_mode = #tpu.pipeline_mode<synchronous>, transform_indices = @transform_1, window_bounds = array<i64: 128, 128>}, {pipeline_mode = #tpu.pipeline_mode<synchronous>, transform_indices = @transform_2, window_bounds = array<i64: 1, 128>}, {transform_indices = @transform_3, window_bounds = array<i64: 1, 8, 128>}]} {
    %c0 = arith.constant 0 : index
    %c0_0 = arith.constant 0 : index
    %c0_1 = arith.constant 0 : index
    %0 = vector.load %arg1[%c0, %c0_0, %c0_1] : memref<1x8x128xf32, #tpu.memory_space<vmem>>, vector<1x8x128xf32>
    %1 = vector.shape_cast %0 : vector<1x8x128xf32> to vector<8x128xf32>
    %c0_2 = arith.constant 0 : index
    %c0_3 = arith.constant 0 : index
    %2 = vector.load %arg2[%c0_2, %c0_3] : memref<128x128xf32, #tpu.memory_space<vmem>>, vector<128x128xf32>
    %cst = arith.constant dense<0.000000e+00> : vector<8x128xf32>
    %3 = tpu.matmul %1, %2, %cst {dimension_numbers = #tpu.dot_dimension_numbers<[1], [1], [0], [0], [0, 0, 1, 0], [], []>} : vector<8x128xf32>, vector<128x128xf32>, vector<8x128xf32> -> vector<8x128xf32>
    %c0_4 = arith.constant 0 : index
    %c0_5 = arith.constant 0 : index
    %4 = vector.load %arg3[%c0_4, %c0_5] : memref<1x128xf32, #tpu.memory_space<vmem>>, vector<1x128xf32>
    %5 = vector.broadcast %4 : vector<1x128xf32> to vector<8x128xf32>
    %6 = arith.addf %3, %5 : vector<8x128xf32>
    %cst_6 = arith.constant dense<0xFF800000> : vector<8xf32>
    %7 = vector.multi_reduction <maximumf>, %6, %cst_6 [1] : vector<8x128xf32> to vector<8xf32>
    %8 = vector.shape_cast %7 : vector<8xf32> to vector<8x1xf32>
    %9 = vector.broadcast %8 : vector<8x1xf32> to vector<8x128xf32>
    %10 = arith.subf %6, %9 : vector<8x128xf32>
    %11 = math.exp %10 : vector<8x128xf32>
    %cst_7 = arith.constant dense<0.000000e+00> : vector<8xf32>
    %12 = vector.multi_reduction <add>, %11, %cst_7 [1] : vector<8x128xf32> to vector<8xf32>
    %13 = vector.shape_cast %12 : vector<8xf32> to vector<8x1xf32>
    %14 = math.log %13 : vector<8x1xf32>
    %15 = vector.broadcast %14 : vector<8x1xf32> to vector<8x128xf32>
    %16 = arith.subf %10, %15 : vector<8x128xf32>
    %c0_8 = arith.constant 0 : index
    %c0_9 = arith.constant 0 : index
    %c0_10 = arith.constant 0 : index
    %17 = vector.load %arg4[%c0_8, %c0_9, %c0_10] : memref<1x8x128xf32, #tpu.memory_space<vmem>>, vector<1x8x128xf32>
    %18 = vector.shape_cast %17 : vector<1x8x128xf32> to vector<8x128xf32>
    %19 = vector.shape_cast %16 : vector<8x128xf32> to vector<1x8x128xf32>
    tpu.vector_store %arg4[%c0_8, %c0_9, %c0_10], %19 {strides = array<i32>} : memref<1x8x128xf32, #tpu.memory_space<vmem>>, vector<1x8x128xf32>,
    return
  }
  func.func @transform_0(%arg0: i32) -> (i32, i32, i32) {
    %c0_i32 = arith.constant 0 : i32
    %c0_i32_0 = arith.constant 0 : i32
    %c0_i32_1 = arith.constant 0 : i32
    return %arg0, %c0_i32, %c0_i32_0 : i32, i32, i32
  }
  func.func @transform_1(%arg0: i32) -> (i32, i32) {
    %c0_i32 = arith.constant 0 : i32
    %c0_i32_0 = arith.constant 0 : i32
    %c0_i32_1 = arith.constant 0 : i32
    return %c0_i32, %c0_i32_0 : i32, i32
  }
  func.func @transform_2(%arg0: i32) -> (i32, i32) {
    %c0_i32 = arith.constant 0 : i32
    %c0_i32_0 = arith.constant 0 : i32
    %c0_i32_1 = arith.constant 0 : i32
    return %c0_i32, %c0_i32_0 : i32, i32
  }
  func.func @transform_3(%arg0: i32) -> (i32, i32, i32) {
    %c0_i32 = arith.constant 0 : i32
    %c0_i32_0 = arith.constant 0 : i32
    %c0_i32_1 = arith.constant 0 : i32
    return %arg0, %c0_i32, %c0_i32_0 : i32, i32, i32
  }
}

module attributes {stable_mosaic.version = 11 : i64} {
  func.func @_ffn_ln_kernel(%arg0: i32, %arg1: memref<1x8x128xf32, #tpu.memory_space<vmem>>, %arg2: memref<1x128xf32, #tpu.memory_space<vmem>>, %arg3: memref<1x128xf32, #tpu.memory_space<vmem>>, %arg4: memref<256x128xf32, #tpu.memory_space<vmem>>, %arg5: memref<1x256xf32, #tpu.memory_space<vmem>>, %arg6: memref<128x256xf32, #tpu.memory_space<vmem>>, %arg7: memref<1x128xf32, #tpu.memory_space<vmem>>, %arg8: memref<1x128xf32, #tpu.memory_space<vmem>>, %arg9: memref<1x128xf32, #tpu.memory_space<vmem>>, %arg10: memref<1x8x128xf32, #tpu.memory_space<vmem>>) attributes {dimension_semantics = [#tpu.dimension_semantics<parallel>], iteration_bounds = array<i64: 2>, scalar_prefetch = 0 : i64, scratch_operands = 0 : i64, tpu.core_type = #tpu.core_type<tc>, window_params = [{transform_indices = @transform_0, window_bounds = array<i64: 1, 8, 128>}, {pipeline_mode = #tpu.pipeline_mode<synchronous>, transform_indices = @transform_1, window_bounds = array<i64: 1, 128>}, {pipeline_mode = #tpu.pipeline_mode<synchronous>, transform_indices = @transform_2, window_bounds = array<i64: 1, 128>}, {pipeline_mode = #tpu.pipeline_mode<synchronous>, transform_indices = @transform_3, window_bounds = array<i64: 256, 128>}, {pipeline_mode = #tpu.pipeline_mode<synchronous>, transform_indices = @transform_4, window_bounds = array<i64: 1, 256>}, {pipeline_mode = #tpu.pipeline_mode<synchronous>, transform_indices = @transform_5, window_bounds = array<i64: 128, 256>}, {pipeline_mode = #tpu.pipeline_mode<synchronous>, transform_indices = @transform_6, window_bounds = array<i64: 1, 128>}, {pipeline_mode = #tpu.pipeline_mode<synchronous>, transform_indices = @transform_7, window_bounds = array<i64: 1, 128>}, {pipeline_mode = #tpu.pipeline_mode<synchronous>, transform_indices = @transform_8, window_bounds = array<i64: 1, 128>}, {transform_indices = @transform_9, window_bounds = array<i64: 1, 8, 128>}]} {
    %c0 = arith.constant 0 : index
    %c0_0 = arith.constant 0 : index
    %c0_1 = arith.constant 0 : index
    %0 = vector.load %arg1[%c0, %c0_0, %c0_1] : memref<1x8x128xf32, #tpu.memory_space<vmem>>, vector<1x8x128xf32>
    %1 = vector.shape_cast %0 : vector<1x8x128xf32> to vector<8x128xf32>
    %c0_2 = arith.constant 0 : index
    %c0_3 = arith.constant 0 : index
    %2 = vector.load %arg2[%c0_2, %c0_3] : memref<1x128xf32, #tpu.memory_space<vmem>>, vector<1x128xf32>
    %c0_4 = arith.constant 0 : index
    %c0_5 = arith.constant 0 : index
    %3 = vector.load %arg3[%c0_4, %c0_5] : memref<1x128xf32, #tpu.memory_space<vmem>>, vector<1x128xf32>
    %cst = arith.constant dense<0.000000e+00> : vector<8xf32>
    %4 = vector.multi_reduction <add>, %1, %cst [1] : vector<8x128xf32> to vector<8xf32>
    %5 = vector.shape_cast %4 : vector<8xf32> to vector<8x1xf32>
    %cst_6 = arith.constant 1.280000e+02 : f32
    %6 = vector.broadcast %cst_6 : f32 to vector<8x1xf32>
    %7 = arith.divf %5, %6 : vector<8x1xf32>
    %8 = vector.broadcast %7 : vector<8x1xf32> to vector<8x128xf32>
    %9 = arith.subf %1, %8 : vector<8x128xf32>
    %10 = arith.mulf %9, %9 : vector<8x128xf32>
    %cst_7 = arith.constant dense<0.000000e+00> : vector<8xf32>
    %11 = vector.multi_reduction <add>, %10, %cst_7 [1] : vector<8x128xf32> to vector<8xf32>
    %12 = vector.shape_cast %11 : vector<8xf32> to vector<8x1xf32>
    %cst_8 = arith.constant 1.280000e+02 : f32
    %13 = vector.broadcast %cst_8 : f32 to vector<8x1xf32>
    %14 = arith.divf %12, %13 : vector<8x1xf32>
    %cst_9 = arith.constant 9.99999974E-6 : f32
    %15 = vector.broadcast %cst_9 : f32 to vector<8x1xf32>
    %16 = arith.addf %14, %15 : vector<8x1xf32>
    %17 = math.rsqrt %16 : vector<8x1xf32>
    %18 = vector.broadcast %17 : vector<8x1xf32> to vector<8x128xf32>
    %19 = arith.mulf %9, %18 : vector<8x128xf32>
    %20 = vector.broadcast %2 : vector<1x128xf32> to vector<8x128xf32>
    %21 = arith.mulf %19, %20 : vector<8x128xf32>
    %22 = vector.broadcast %3 : vector<1x128xf32> to vector<8x128xf32>
    %23 = arith.addf %21, %22 : vector<8x128xf32>
    %c0_10 = arith.constant 0 : index
    %c0_11 = arith.constant 0 : index
    %24 = vector.load %arg4[%c0_10, %c0_11] : memref<256x128xf32, #tpu.memory_space<vmem>>, vector<256x128xf32>
    %cst_12 = arith.constant dense<0.000000e+00> : vector<8x256xf32>
    %25 = tpu.matmul %23, %24, %cst_12 {dimension_numbers = #tpu.dot_dimension_numbers<[1], [1], [0], [0], [0, 0, 1, 0], [], []>} : vector<8x128xf32>, vector<256x128xf32>, vector<8x256xf32> -> vector<8x256xf32>
    %c0_13 = arith.constant 0 : index
    %c0_14 = arith.constant 0 : index
    %26 = vector.load %arg5[%c0_13, %c0_14] : memref<1x256xf32, #tpu.memory_space<vmem>>, vector<1x256xf32>
    %27 = vector.broadcast %26 : vector<1x256xf32> to vector<8x256xf32>
    %28 = arith.addf %25, %27 : vector<8x256xf32>
    %cst_15 = arith.constant 0.000000e+00 : f32
    %29 = vector.broadcast %cst_15 : f32 to vector<8x256xf32>
    %30 = arith.maximumf %28, %29 : vector<8x256xf32>
    %c0_16 = arith.constant 0 : index
    %c0_17 = arith.constant 0 : index
    %31 = vector.load %arg6[%c0_16, %c0_17] : memref<128x256xf32, #tpu.memory_space<vmem>>, vector<128x256xf32>
    %cst_18 = arith.constant dense<0.000000e+00> : vector<8x128xf32>
    %32 = tpu.matmul %30, %31, %cst_18 {dimension_numbers = #tpu.dot_dimension_numbers<[1], [1], [0], [0], [0, 0, 1, 0], [], []>} : vector<8x256xf32>, vector<128x256xf32>, vector<8x128xf32> -> vector<8x128xf32>
    %c0_19 = arith.constant 0 : index
    %c0_20 = arith.constant 0 : index
    %33 = vector.load %arg7[%c0_19, %c0_20] : memref<1x128xf32, #tpu.memory_space<vmem>>, vector<1x128xf32>
    %34 = vector.broadcast %33 : vector<1x128xf32> to vector<8x128xf32>
    %35 = arith.addf %32, %34 : vector<8x128xf32>
    %36 = arith.addf %35, %1 : vector<8x128xf32>
    %c0_21 = arith.constant 0 : index
    %c0_22 = arith.constant 0 : index
    %37 = vector.load %arg8[%c0_21, %c0_22] : memref<1x128xf32, #tpu.memory_space<vmem>>, vector<1x128xf32>
    %c0_23 = arith.constant 0 : index
    %c0_24 = arith.constant 0 : index
    %38 = vector.load %arg9[%c0_23, %c0_24] : memref<1x128xf32, #tpu.memory_space<vmem>>, vector<1x128xf32>
    %cst_25 = arith.constant dense<0.000000e+00> : vector<8xf32>
    %39 = vector.multi_reduction <add>, %36, %cst_25 [1] : vector<8x128xf32> to vector<8xf32>
    %40 = vector.shape_cast %39 : vector<8xf32> to vector<8x1xf32>
    %cst_26 = arith.constant 1.280000e+02 : f32
    %41 = vector.broadcast %cst_26 : f32 to vector<8x1xf32>
    %42 = arith.divf %40, %41 : vector<8x1xf32>
    %43 = vector.broadcast %42 : vector<8x1xf32> to vector<8x128xf32>
    %44 = arith.subf %36, %43 : vector<8x128xf32>
    %45 = arith.mulf %44, %44 : vector<8x128xf32>
    %cst_27 = arith.constant dense<0.000000e+00> : vector<8xf32>
    %46 = vector.multi_reduction <add>, %45, %cst_27 [1] : vector<8x128xf32> to vector<8xf32>
    %47 = vector.shape_cast %46 : vector<8xf32> to vector<8x1xf32>
    %cst_28 = arith.constant 1.280000e+02 : f32
    %48 = vector.broadcast %cst_28 : f32 to vector<8x1xf32>
    %49 = arith.divf %47, %48 : vector<8x1xf32>
    %cst_29 = arith.constant 9.99999974E-6 : f32
    %50 = vector.broadcast %cst_29 : f32 to vector<8x1xf32>
    %51 = arith.addf %49, %50 : vector<8x1xf32>
    %52 = math.rsqrt %51 : vector<8x1xf32>
    %53 = vector.broadcast %52 : vector<8x1xf32> to vector<8x128xf32>
    %54 = arith.mulf %44, %53 : vector<8x128xf32>
    %55 = vector.broadcast %37 : vector<1x128xf32> to vector<8x128xf32>
    %56 = arith.mulf %54, %55 : vector<8x128xf32>
    %57 = vector.broadcast %38 : vector<1x128xf32> to vector<8x128xf32>
    %58 = arith.addf %56, %57 : vector<8x128xf32>
    %c0_30 = arith.constant 0 : index
    %c0_31 = arith.constant 0 : index
    %c0_32 = arith.constant 0 : index
    %59 = vector.load %arg10[%c0_30, %c0_31, %c0_32] : memref<1x8x128xf32, #tpu.memory_space<vmem>>, vector<1x8x128xf32>
    %60 = vector.shape_cast %59 : vector<1x8x128xf32> to vector<8x128xf32>
    %61 = vector.shape_cast %58 : vector<8x128xf32> to vector<1x8x128xf32>
    tpu.vector_store %arg10[%c0_30, %c0_31, %c0_32], %61 {strides = array<i32>} : memref<1x8x128xf32, #tpu.memory_space<vmem>>, vector<1x8x128xf32>,
    return
  }
  func.func @transform_0(%arg0: i32) -> (i32, i32, i32) {
    %c0_i32 = arith.constant 0 : i32
    %c0_i32_0 = arith.constant 0 : i32
    %c0_i32_1 = arith.constant 0 : i32
    return %arg0, %c0_i32, %c0_i32_0 : i32, i32, i32
  }
  func.func @transform_1(%arg0: i32) -> (i32, i32) {
    %c0_i32 = arith.constant 0 : i32
    %c0_i32_0 = arith.constant 0 : i32
    %c0_i32_1 = arith.constant 0 : i32
    return %c0_i32, %c0_i32_0 : i32, i32
  }
  func.func @transform_2(%arg0: i32) -> (i32, i32) {
    %c0_i32 = arith.constant 0 : i32
    %c0_i32_0 = arith.constant 0 : i32
    %c0_i32_1 = arith.constant 0 : i32
    return %c0_i32, %c0_i32_0 : i32, i32
  }
  func.func @transform_3(%arg0: i32) -> (i32, i32) {
    %c0_i32 = arith.constant 0 : i32
    %c0_i32_0 = arith.constant 0 : i32
    %c0_i32_1 = arith.constant 0 : i32
    return %c0_i32, %c0_i32_0 : i32, i32
  }
  func.func @transform_4(%arg0: i32) -> (i32, i32) {
    %c0_i32 = arith.constant 0 : i32
    %c0_i32_0 = arith.constant 0 : i32
    %c0_i32_1 = arith.constant 0 : i32
    return %c0_i32, %c0_i32_0 : i32, i32
  }
  func.func @transform_5(%arg0: i32) -> (i32, i32) {
    %c0_i32 = arith.constant 0 : i32
    %c0_i32_0 = arith.constant 0 : i32
    %c0_i32_1 = arith.constant 0 : i32
    return %c0_i32, %c0_i32_0 : i32, i32
  }
  func.func @transform_6(%arg0: i32) -> (i32, i32) {
    %c0_i32 = arith.constant 0 : i32
    %c0_i32_0 = arith.constant 0 : i32
    %c0_i32_1 = arith.constant 0 : i32
    return %c0_i32, %c0_i32_0 : i32, i32
  }
  func.func @transform_7(%arg0: i32) -> (i32, i32) {
    %c0_i32 = arith.constant 0 : i32
    %c0_i32_0 = arith.constant 0 : i32
    %c0_i32_1 = arith.constant 0 : i32
    return %c0_i32, %c0_i32_0 : i32, i32
  }
  func.func @transform_8(%arg0: i32) -> (i32, i32) {
    %c0_i32 = arith.constant 0 : i32
    %c0_i32_0 = arith.constant 0 : i32
    %c0_i32_1 = arith.constant 0 : i32
    return %c0_i32, %c0_i32_0 : i32, i32
  }
  func.func @transform_9(%arg0: i32) -> (i32, i32, i32) {
    %c0_i32 = arith.constant 0 : i32
    %c0_i32_0 = arith.constant 0 : i32
    %c0_i32_1 = arith.constant 0 : i32
    return %arg0, %c0_i32, %c0_i32_0 : i32, i32, i32
  }
}

module attributes {stable_mosaic.version = 11 : i64} {
  func.func @_mha_ln_kernel(%arg0: i32, %arg1: memref<1x8x128xf32, #tpu.memory_space<vmem>>, %arg2: memref<1x8x128xf32, #tpu.memory_space<vmem>>, %arg3: memref<1x8x8xf32, #tpu.memory_space<vmem>>, %arg4: memref<128x128xf32, #tpu.memory_space<vmem>>, %arg5: memref<128x128xf32, #tpu.memory_space<vmem>>, %arg6: memref<128x128xf32, #tpu.memory_space<vmem>>, %arg7: memref<128x128xf32, #tpu.memory_space<vmem>>, %arg8: memref<1x128xf32, #tpu.memory_space<vmem>>, %arg9: memref<1x128xf32, #tpu.memory_space<vmem>>, %arg10: memref<1x128xf32, #tpu.memory_space<vmem>>, %arg11: memref<1x8x128xf32, #tpu.memory_space<vmem>>) attributes {dimension_semantics = [#tpu.dimension_semantics<parallel>], iteration_bounds = array<i64: 2>, scalar_prefetch = 0 : i64, scratch_operands = 0 : i64, tpu.core_type = #tpu.core_type<tc>, window_params = [{transform_indices = @transform_0, window_bounds = array<i64: 1, 8, 128>}, {transform_indices = @transform_1, window_bounds = array<i64: 1, 8, 128>}, {transform_indices = @transform_2, window_bounds = array<i64: 1, 8, 8>}, {pipeline_mode = #tpu.pipeline_mode<synchronous>, transform_indices = @transform_3, window_bounds = array<i64: 128, 128>}, {pipeline_mode = #tpu.pipeline_mode<synchronous>, transform_indices = @transform_4, window_bounds = array<i64: 128, 128>}, {pipeline_mode = #tpu.pipeline_mode<synchronous>, transform_indices = @transform_5, window_bounds = array<i64: 128, 128>}, {pipeline_mode = #tpu.pipeline_mode<synchronous>, transform_indices = @transform_6, window_bounds = array<i64: 128, 128>}, {pipeline_mode = #tpu.pipeline_mode<synchronous>, transform_indices = @transform_7, window_bounds = array<i64: 1, 128>}, {pipeline_mode = #tpu.pipeline_mode<synchronous>, transform_indices = @transform_8, window_bounds = array<i64: 1, 128>}, {pipeline_mode = #tpu.pipeline_mode<synchronous>, transform_indices = @transform_9, window_bounds = array<i64: 1, 128>}, {transform_indices = @transform_10, window_bounds = array<i64: 1, 8, 128>}]} {
    %c0 = arith.constant 0 : index
    %c0_0 = arith.constant 0 : index
    %c0_1 = arith.constant 0 : index
    %0 = vector.load %arg1[%c0, %c0_0, %c0_1] : memref<1x8x128xf32, #tpu.memory_space<vmem>>, vector<1x8x128xf32>
    %1 = vector.shape_cast %0 : vector<1x8x128xf32> to vector<8x128xf32>
    %c0_2 = arith.constant 0 : index
    %c0_3 = arith.constant 0 : index
    %c0_4 = arith.constant 0 : index
    %2 = vector.load %arg2[%c0_2, %c0_3, %c0_4] : memref<1x8x128xf32, #tpu.memory_space<vmem>>, vector<1x8x128xf32>
    %3 = vector.shape_cast %2 : vector<1x8x128xf32> to vector<8x128xf32>
    %c0_5 = arith.constant 0 : index
    %c0_6 = arith.constant 0 : index
    %c0_7 = arith.constant 0 : index
    %4 = vector.load %arg3[%c0_5, %c0_6, %c0_7] : memref<1x8x8xf32, #tpu.memory_space<vmem>>, vector<1x8x8xf32>
    %5 = vector.shape_cast %4 : vector<1x8x8xf32> to vector<8x8xf32>
    %cst = arith.constant 0.176776692 : f32
    %6 = vector.broadcast %cst : f32 to vector<8x128xf32>
    %7 = arith.mulf %1, %6 : vector<8x128xf32>
    %cst_8 = arith.constant 0.000000e+00 : f32
    %8 = vector.broadcast %cst_8 : f32 to vector<8x128xf32>
    %c0_9 = arith.constant 0 : index
    %c0_10 = arith.constant 0 : index
    %9 = vector.load %arg4[%c0_9, %c0_10] : memref<128x128xf32, #tpu.memory_space<vmem>>, vector<32x128xf32>
    %cst_11 = arith.constant dense<0.000000e+00> : vector<8x32xf32>
    %10 = tpu.matmul %7, %9, %cst_11 {dimension_numbers = #tpu.dot_dimension_numbers<[1], [1], [0], [0], [0, 0, 1, 0], [], []>} : vector<8x128xf32>, vector<32x128xf32>, vector<8x32xf32> -> vector<8x32xf32>
    %c0_12 = arith.constant 0 : index
    %c0_13 = arith.constant 0 : index
    %11 = vector.load %arg5[%c0_12, %c0_13] : memref<128x128xf32, #tpu.memory_space<vmem>>, vector<32x128xf32>
    %cst_14 = arith.constant dense<0.000000e+00> : vector<8x32xf32>
    %12 = tpu.matmul %3, %11, %cst_14 {dimension_numbers = #tpu.dot_dimension_numbers<[1], [1], [0], [0], [0, 0, 1, 0], [], []>} : vector<8x128xf32>, vector<32x128xf32>, vector<8x32xf32> -> vector<8x32xf32>
    %c0_15 = arith.constant 0 : index
    %c0_16 = arith.constant 0 : index
    %13 = vector.load %arg6[%c0_15, %c0_16] : memref<128x128xf32, #tpu.memory_space<vmem>>, vector<32x128xf32>
    %cst_17 = arith.constant dense<0.000000e+00> : vector<8x32xf32>
    %14 = tpu.matmul %3, %13, %cst_17 {dimension_numbers = #tpu.dot_dimension_numbers<[1], [1], [0], [0], [0, 0, 1, 0], [], []>} : vector<8x128xf32>, vector<32x128xf32>, vector<8x32xf32> -> vector<8x32xf32>
    %cst_18 = arith.constant dense<0.000000e+00> : vector<8x8xf32>
    %15 = tpu.matmul %10, %12, %cst_18 {dimension_numbers = #tpu.dot_dimension_numbers<[1], [1], [0], [0], [0, 0, 1, 0], [], []>} : vector<8x32xf32>, vector<8x32xf32>, vector<8x8xf32> -> vector<8x8xf32>
    %cst_19 = arith.constant 0.000000e+00 : f32
    %16 = vector.broadcast %cst_19 : f32 to vector<8x8xf32>
    %17 = arith.cmpf oeq, %5, %16 : vector<8x8xf32>
    %cst_20 = arith.constant -1.000000e+09 : f32
    %18 = vector.broadcast %cst_20 : f32 to vector<8x8xf32>
    %19 = arith.select %17, %18, %15 : vector<8x8xi1>, vector<8x8xf32>
    %cst_21 = arith.constant dense<0xFF800000> : vector<8xf32>
    %20 = vector.multi_reduction <maximumf>, %19, %cst_21 [1] : vector<8x8xf32> to vector<8xf32>
    %21 = vector.shape_cast %20 : vector<8xf32> to vector<8x1xf32>
    %22 = vector.broadcast %21 : vector<8x1xf32> to vector<8x8xf32>
    %23 = arith.subf %19, %22 : vector<8x8xf32>
    %24 = math.exp %23 : vector<8x8xf32>
    %cst_22 = arith.constant dense<0.000000e+00> : vector<8xf32>
    %25 = vector.multi_reduction <add>, %24, %cst_22 [1] : vector<8x8xf32> to vector<8xf32>
    %26 = vector.shape_cast %25 : vector<8xf32> to vector<8x1xf32>
    %27 = tpu.reciprocal %26 {approx = true} : vector<8x1xf32> -> vector<8x1xf32>
    %28 = vector.broadcast %27 : vector<8x1xf32> to vector<8x8xf32>
    %29 = arith.mulf %24, %28 : vector<8x8xf32>
    %cst_23 = arith.constant dense<0.000000e+00> : vector<8x32xf32>
    %30 = tpu.matmul %29, %14, %cst_23 {dimension_numbers = #tpu.dot_dimension_numbers<[1], [0], [0], [1], [0, 0, 1, 1], [], []>} : vector<8x8xf32>, vector<8x32xf32>, vector<8x32xf32> -> vector<8x32xf32>
    %c0_24 = arith.constant 0 : index
    %c0_25 = arith.constant 0 : index
    %31 = vector.load %arg7[%c0_24, %c0_25] : memref<128x128xf32, #tpu.memory_space<vmem>>, vector<32x128xf32>
    %cst_26 = arith.constant dense<0.000000e+00> : vector<8x128xf32>
    %32 = tpu.matmul %30, %31, %cst_26 {dimension_numbers = #tpu.dot_dimension_numbers<[1], [0], [0], [1], [0, 0, 1, 1], [], []>} : vector<8x32xf32>, vector<32x128xf32>, vector<8x128xf32> -> vector<8x128xf32>
    %33 = arith.addf %8, %32 : vector<8x128xf32>
    %c32 = arith.constant 32 : index
    %c0_27 = arith.constant 0 : index
    %34 = vector.load %arg4[%c32, %c0_27] : memref<128x128xf32, #tpu.memory_space<vmem>>, vector<32x128xf32>
    %cst_28 = arith.constant dense<0.000000e+00> : vector<8x32xf32>
    %35 = tpu.matmul %7, %34, %cst_28 {dimension_numbers = #tpu.dot_dimension_numbers<[1], [1], [0], [0], [0, 0, 1, 0], [], []>} : vector<8x128xf32>, vector<32x128xf32>, vector<8x32xf32> -> vector<8x32xf32>
    %c32_29 = arith.constant 32 : index
    %c0_30 = arith.constant 0 : index
    %36 = vector.load %arg5[%c32_29, %c0_30] : memref<128x128xf32, #tpu.memory_space<vmem>>, vector<32x128xf32>
    %cst_31 = arith.constant dense<0.000000e+00> : vector<8x32xf32>
    %37 = tpu.matmul %3, %36, %cst_31 {dimension_numbers = #tpu.dot_dimension_numbers<[1], [1], [0], [0], [0, 0, 1, 0], [], []>} : vector<8x128xf32>, vector<32x128xf32>, vector<8x32xf32> -> vector<8x32xf32>
    %c32_32 = arith.constant 32 : index
    %c0_33 = arith.constant 0 : index
    %38 = vector.load %arg6[%c32_32, %c0_33] : memref<128x128xf32, #tpu.memory_space<vmem>>, vector<32x128xf32>
    %cst_34 = arith.constant dense<0.000000e+00> : vector<8x32xf32>
    %39 = tpu.matmul %3, %38, %cst_34 {dimension_numbers = #tpu.dot_dimension_numbers<[1], [1], [0], [0], [0, 0, 1, 0], [], []>} : vector<8x128xf32>, vector<32x128xf32>, vector<8x32xf32> -> vector<8x32xf32>
    %cst_35 = arith.constant dense<0.000000e+00> : vector<8x8xf32>
    %40 = tpu.matmul %35, %37, %cst_35 {dimension_numbers = #tpu.dot_dimension_numbers<[1], [1], [0], [0], [0, 0, 1, 0], [], []>} : vector<8x32xf32>, vector<8x32xf32>, vector<8x8xf32> -> vector<8x8xf32>
    %cst_36 = arith.constant 0.000000e+00 : f32
    %41 = vector.broadcast %cst_36 : f32 to vector<8x8xf32>
    %42 = arith.cmpf oeq, %5, %41 : vector<8x8xf32>
    %cst_37 = arith.constant -1.000000e+09 : f32
    %43 = vector.broadcast %cst_37 : f32 to vector<8x8xf32>
    %44 = arith.select %42, %43, %40 : vector<8x8xi1>, vector<8x8xf32>
    %cst_38 = arith.constant dense<0xFF800000> : vector<8xf32>
    %45 = vector.multi_reduction <maximumf>, %44, %cst_38 [1] : vector<8x8xf32> to vector<8xf32>
    %46 = vector.shape_cast %45 : vector<8xf32> to vector<8x1xf32>
    %47 = vector.broadcast %46 : vector<8x1xf32> to vector<8x8xf32>
    %48 = arith.subf %44, %47 : vector<8x8xf32>
    %49 = math.exp %48 : vector<8x8xf32>
    %cst_39 = arith.constant dense<0.000000e+00> : vector<8xf32>
    %50 = vector.multi_reduction <add>, %49, %cst_39 [1] : vector<8x8xf32> to vector<8xf32>
    %51 = vector.shape_cast %50 : vector<8xf32> to vector<8x1xf32>
    %52 = tpu.reciprocal %51 {approx = true} : vector<8x1xf32> -> vector<8x1xf32>
    %53 = vector.broadcast %52 : vector<8x1xf32> to vector<8x8xf32>
    %54 = arith.mulf %49, %53 : vector<8x8xf32>
    %cst_40 = arith.constant dense<0.000000e+00> : vector<8x32xf32>
    %55 = tpu.matmul %54, %39, %cst_40 {dimension_numbers = #tpu.dot_dimension_numbers<[1], [0], [0], [1], [0, 0, 1, 1], [], []>} : vector<8x8xf32>, vector<8x32xf32>, vector<8x32xf32> -> vector<8x32xf32>
    %c32_41 = arith.constant 32 : index
    %c0_42 = arith.constant 0 : index
    %56 = vector.load %arg7[%c32_41, %c0_42] : memref<128x128xf32, #tpu.memory_space<vmem>>, vector<32x128xf32>
    %cst_43 = arith.constant dense<0.000000e+00> : vector<8x128xf32>
    %57 = tpu.matmul %55, %56, %cst_43 {dimension_numbers = #tpu.dot_dimension_numbers<[1], [0], [0], [1], [0, 0, 1, 1], [], []>} : vector<8x32xf32>, vector<32x128xf32>, vector<8x128xf32> -> vector<8x128xf32>
    %58 = arith.addf %33, %57 : vector<8x128xf32>
    %c64 = arith.constant 64 : index
    %c0_44 = arith.constant 0 : index
    %59 = vector.load %arg4[%c64, %c0_44] : memref<128x128xf32, #tpu.memory_space<vmem>>, vector<32x128xf32>
    %cst_45 = arith.constant dense<0.000000e+00> : vector<8x32xf32>
    %60 = tpu.matmul %7, %59, %cst_45 {dimension_numbers = #tpu.dot_dimension_numbers<[1], [1], [0], [0], [0, 0, 1, 0], [], []>} : vector<8x128xf32>, vector<32x128xf32>, vector<8x32xf32> -> vector<8x32xf32>
    %c64_46 = arith.constant 64 : index
    %c0_47 = arith.constant 0 : index
    %61 = vector.load %arg5[%c64_46, %c0_47] : memref<128x128xf32, #tpu.memory_space<vmem>>, vector<32x128xf32>
    %cst_48 = arith.constant dense<0.000000e+00> : vector<8x32xf32>
    %62 = tpu.matmul %3, %61, %cst_48 {dimension_numbers = #tpu.dot_dimension_numbers<[1], [1], [0], [0], [0, 0, 1, 0], [], []>} : vector<8x128xf32>, vector<32x128xf32>, vector<8x32xf32> -> vector<8x32xf32>
    %c64_49 = arith.constant 64 : index
    %c0_50 = arith.constant 0 : index
    %63 = vector.load %arg6[%c64_49, %c0_50] : memref<128x128xf32, #tpu.memory_space<vmem>>, vector<32x128xf32>
    %cst_51 = arith.constant dense<0.000000e+00> : vector<8x32xf32>
    %64 = tpu.matmul %3, %63, %cst_51 {dimension_numbers = #tpu.dot_dimension_numbers<[1], [1], [0], [0], [0, 0, 1, 0], [], []>} : vector<8x128xf32>, vector<32x128xf32>, vector<8x32xf32> -> vector<8x32xf32>
    %cst_52 = arith.constant dense<0.000000e+00> : vector<8x8xf32>
    %65 = tpu.matmul %60, %62, %cst_52 {dimension_numbers = #tpu.dot_dimension_numbers<[1], [1], [0], [0], [0, 0, 1, 0], [], []>} : vector<8x32xf32>, vector<8x32xf32>, vector<8x8xf32> -> vector<8x8xf32>
    %cst_53 = arith.constant 0.000000e+00 : f32
    %66 = vector.broadcast %cst_53 : f32 to vector<8x8xf32>
    %67 = arith.cmpf oeq, %5, %66 : vector<8x8xf32>
    %cst_54 = arith.constant -1.000000e+09 : f32
    %68 = vector.broadcast %cst_54 : f32 to vector<8x8xf32>
    %69 = arith.select %67, %68, %65 : vector<8x8xi1>, vector<8x8xf32>
    %cst_55 = arith.constant dense<0xFF800000> : vector<8xf32>
    %70 = vector.multi_reduction <maximumf>, %69, %cst_55 [1] : vector<8x8xf32> to vector<8xf32>
    %71 = vector.shape_cast %70 : vector<8xf32> to vector<8x1xf32>
    %72 = vector.broadcast %71 : vector<8x1xf32> to vector<8x8xf32>
    %73 = arith.subf %69, %72 : vector<8x8xf32>
    %74 = math.exp %73 : vector<8x8xf32>
    %cst_56 = arith.constant dense<0.000000e+00> : vector<8xf32>
    %75 = vector.multi_reduction <add>, %74, %cst_56 [1] : vector<8x8xf32> to vector<8xf32>
    %76 = vector.shape_cast %75 : vector<8xf32> to vector<8x1xf32>
    %77 = tpu.reciprocal %76 {approx = true} : vector<8x1xf32> -> vector<8x1xf32>
    %78 = vector.broadcast %77 : vector<8x1xf32> to vector<8x8xf32>
    %79 = arith.mulf %74, %78 : vector<8x8xf32>
    %cst_57 = arith.constant dense<0.000000e+00> : vector<8x32xf32>
    %80 = tpu.matmul %79, %64, %cst_57 {dimension_numbers = #tpu.dot_dimension_numbers<[1], [0], [0], [1], [0, 0, 1, 1], [], []>} : vector<8x8xf32>, vector<8x32xf32>, vector<8x32xf32> -> vector<8x32xf32>
    %c64_58 = arith.constant 64 : index
    %c0_59 = arith.constant 0 : index
    %81 = vector.load %arg7[%c64_58, %c0_59] : memref<128x128xf32, #tpu.memory_space<vmem>>, vector<32x128xf32>
    %cst_60 = arith.constant dense<0.000000e+00> : vector<8x128xf32>
    %82 = tpu.matmul %80, %81, %cst_60 {dimension_numbers = #tpu.dot_dimension_numbers<[1], [0], [0], [1], [0, 0, 1, 1], [], []>} : vector<8x32xf32>, vector<32x128xf32>, vector<8x128xf32> -> vector<8x128xf32>
    %83 = arith.addf %58, %82 : vector<8x128xf32>
    %c96 = arith.constant 96 : index
    %c0_61 = arith.constant 0 : index
    %84 = vector.load %arg4[%c96, %c0_61] : memref<128x128xf32, #tpu.memory_space<vmem>>, vector<32x128xf32>
    %cst_62 = arith.constant dense<0.000000e+00> : vector<8x32xf32>
    %85 = tpu.matmul %7, %84, %cst_62 {dimension_numbers = #tpu.dot_dimension_numbers<[1], [1], [0], [0], [0, 0, 1, 0], [], []>} : vector<8x128xf32>, vector<32x128xf32>, vector<8x32xf32> -> vector<8x32xf32>
    %c96_63 = arith.constant 96 : index
    %c0_64 = arith.constant 0 : index
    %86 = vector.load %arg5[%c96_63, %c0_64] : memref<128x128xf32, #tpu.memory_space<vmem>>, vector<32x128xf32>
    %cst_65 = arith.constant dense<0.000000e+00> : vector<8x32xf32>
    %87 = tpu.matmul %3, %86, %cst_65 {dimension_numbers = #tpu.dot_dimension_numbers<[1], [1], [0], [0], [0, 0, 1, 0], [], []>} : vector<8x128xf32>, vector<32x128xf32>, vector<8x32xf32> -> vector<8x32xf32>
    %c96_66 = arith.constant 96 : index
    %c0_67 = arith.constant 0 : index
    %88 = vector.load %arg6[%c96_66, %c0_67] : memref<128x128xf32, #tpu.memory_space<vmem>>, vector<32x128xf32>
    %cst_68 = arith.constant dense<0.000000e+00> : vector<8x32xf32>
    %89 = tpu.matmul %3, %88, %cst_68 {dimension_numbers = #tpu.dot_dimension_numbers<[1], [1], [0], [0], [0, 0, 1, 0], [], []>} : vector<8x128xf32>, vector<32x128xf32>, vector<8x32xf32> -> vector<8x32xf32>
    %cst_69 = arith.constant dense<0.000000e+00> : vector<8x8xf32>
    %90 = tpu.matmul %85, %87, %cst_69 {dimension_numbers = #tpu.dot_dimension_numbers<[1], [1], [0], [0], [0, 0, 1, 0], [], []>} : vector<8x32xf32>, vector<8x32xf32>, vector<8x8xf32> -> vector<8x8xf32>
    %cst_70 = arith.constant 0.000000e+00 : f32
    %91 = vector.broadcast %cst_70 : f32 to vector<8x8xf32>
    %92 = arith.cmpf oeq, %5, %91 : vector<8x8xf32>
    %cst_71 = arith.constant -1.000000e+09 : f32
    %93 = vector.broadcast %cst_71 : f32 to vector<8x8xf32>
    %94 = arith.select %92, %93, %90 : vector<8x8xi1>, vector<8x8xf32>
    %cst_72 = arith.constant dense<0xFF800000> : vector<8xf32>
    %95 = vector.multi_reduction <maximumf>, %94, %cst_72 [1] : vector<8x8xf32> to vector<8xf32>
    %96 = vector.shape_cast %95 : vector<8xf32> to vector<8x1xf32>
    %97 = vector.broadcast %96 : vector<8x1xf32> to vector<8x8xf32>
    %98 = arith.subf %94, %97 : vector<8x8xf32>
    %99 = math.exp %98 : vector<8x8xf32>
    %cst_73 = arith.constant dense<0.000000e+00> : vector<8xf32>
    %100 = vector.multi_reduction <add>, %99, %cst_73 [1] : vector<8x8xf32> to vector<8xf32>
    %101 = vector.shape_cast %100 : vector<8xf32> to vector<8x1xf32>
    %102 = tpu.reciprocal %101 {approx = true} : vector<8x1xf32> -> vector<8x1xf32>
    %103 = vector.broadcast %102 : vector<8x1xf32> to vector<8x8xf32>
    %104 = arith.mulf %99, %103 : vector<8x8xf32>
    %cst_74 = arith.constant dense<0.000000e+00> : vector<8x32xf32>
    %105 = tpu.matmul %104, %89, %cst_74 {dimension_numbers = #tpu.dot_dimension_numbers<[1], [0], [0], [1], [0, 0, 1, 1], [], []>} : vector<8x8xf32>, vector<8x32xf32>, vector<8x32xf32> -> vector<8x32xf32>
    %c96_75 = arith.constant 96 : index
    %c0_76 = arith.constant 0 : index
    %106 = vector.load %arg7[%c96_75, %c0_76] : memref<128x128xf32, #tpu.memory_space<vmem>>, vector<32x128xf32>
    %cst_77 = arith.constant dense<0.000000e+00> : vector<8x128xf32>
    %107 = tpu.matmul %105, %106, %cst_77 {dimension_numbers = #tpu.dot_dimension_numbers<[1], [0], [0], [1], [0, 0, 1, 1], [], []>} : vector<8x32xf32>, vector<32x128xf32>, vector<8x128xf32> -> vector<8x128xf32>
    %108 = arith.addf %83, %107 : vector<8x128xf32>
    %c0_78 = arith.constant 0 : index
    %c0_79 = arith.constant 0 : index
    %109 = vector.load %arg8[%c0_78, %c0_79] : memref<1x128xf32, #tpu.memory_space<vmem>>, vector<1x128xf32>
    %110 = vector.broadcast %109 : vector<1x128xf32> to vector<8x128xf32>
    %111 = arith.addf %108, %110 : vector<8x128xf32>
    %112 = arith.addf %111, %1 : vector<8x128xf32>
    %c0_80 = arith.constant 0 : index
    %c0_81 = arith.constant 0 : index
    %113 = vector.load %arg9[%c0_80, %c0_81] : memref<1x128xf32, #tpu.memory_space<vmem>>, vector<1x128xf32>
    %c0_82 = arith.constant 0 : index
    %c0_83 = arith.constant 0 : index
    %114 = vector.load %arg10[%c0_82, %c0_83] : memref<1x128xf32, #tpu.memory_space<vmem>>, vector<1x128xf32>
    %cst_84 = arith.constant dense<0.000000e+00> : vector<8xf32>
    %115 = vector.multi_reduction <add>, %112, %cst_84 [1] : vector<8x128xf32> to vector<8xf32>
    %116 = vector.shape_cast %115 : vector<8xf32> to vector<8x1xf32>
    %cst_85 = arith.constant 1.280000e+02 : f32
    %117 = vector.broadcast %cst_85 : f32 to vector<8x1xf32>
    %118 = arith.divf %116, %117 : vector<8x1xf32>
    %119 = vector.broadcast %118 : vector<8x1xf32> to vector<8x128xf32>
    %120 = arith.subf %112, %119 : vector<8x128xf32>
    %121 = arith.mulf %120, %120 : vector<8x128xf32>
    %cst_86 = arith.constant dense<0.000000e+00> : vector<8xf32>
    %122 = vector.multi_reduction <add>, %121, %cst_86 [1] : vector<8x128xf32> to vector<8xf32>
    %123 = vector.shape_cast %122 : vector<8xf32> to vector<8x1xf32>
    %cst_87 = arith.constant 1.280000e+02 : f32
    %124 = vector.broadcast %cst_87 : f32 to vector<8x1xf32>
    %125 = arith.divf %123, %124 : vector<8x1xf32>
    %cst_88 = arith.constant 9.99999974E-6 : f32
    %126 = vector.broadcast %cst_88 : f32 to vector<8x1xf32>
    %127 = arith.addf %125, %126 : vector<8x1xf32>
    %128 = math.rsqrt %127 : vector<8x1xf32>
    %129 = vector.broadcast %128 : vector<8x1xf32> to vector<8x128xf32>
    %130 = arith.mulf %120, %129 : vector<8x128xf32>
    %131 = vector.broadcast %113 : vector<1x128xf32> to vector<8x128xf32>
    %132 = arith.mulf %130, %131 : vector<8x128xf32>
    %133 = vector.broadcast %114 : vector<1x128xf32> to vector<8x128xf32>
    %134 = arith.addf %132, %133 : vector<8x128xf32>
    %c0_89 = arith.constant 0 : index
    %c0_90 = arith.constant 0 : index
    %c0_91 = arith.constant 0 : index
    %135 = vector.load %arg11[%c0_89, %c0_90, %c0_91] : memref<1x8x128xf32, #tpu.memory_space<vmem>>, vector<1x8x128xf32>
    %136 = vector.shape_cast %135 : vector<1x8x128xf32> to vector<8x128xf32>
    %137 = vector.shape_cast %134 : vector<8x128xf32> to vector<1x8x128xf32>
    tpu.vector_store %arg11[%c0_89, %c0_90, %c0_91], %137 {strides = array<i32>} : memref<1x8x128xf32, #tpu.memory_space<vmem>>, vector<1x8x128xf32>,
    return
  }
  func.func @transform_0(%arg0: i32) -> (i32, i32, i32) {
    %c0_i32 = arith.constant 0 : i32
    %c0_i32_0 = arith.constant 0 : i32
    %c0_i32_1 = arith.constant 0 : i32
    return %arg0, %c0_i32, %c0_i32_0 : i32, i32, i32
  }
  func.func @transform_1(%arg0: i32) -> (i32, i32, i32) {
    %c0_i32 = arith.constant 0 : i32
    %c0_i32_0 = arith.constant 0 : i32
    %c0_i32_1 = arith.constant 0 : i32
    return %arg0, %c0_i32, %c0_i32_0 : i32, i32, i32
  }
  func.func @transform_2(%arg0: i32) -> (i32, i32, i32) {
    %c0_i32 = arith.constant 0 : i32
    %c0_i32_0 = arith.constant 0 : i32
    %c0_i32_1 = arith.constant 0 : i32
    return %arg0, %c0_i32, %c0_i32_0 : i32, i32, i32
  }
  func.func @transform_3(%arg0: i32) -> (i32, i32) {
    %c0_i32 = arith.constant 0 : i32
    %c0_i32_0 = arith.constant 0 : i32
    %c0_i32_1 = arith.constant 0 : i32
    return %c0_i32, %c0_i32_0 : i32, i32
  }
  func.func @transform_4(%arg0: i32) -> (i32, i32) {
    %c0_i32 = arith.constant 0 : i32
    %c0_i32_0 = arith.constant 0 : i32
    %c0_i32_1 = arith.constant 0 : i32
    return %c0_i32, %c0_i32_0 : i32, i32
  }
  func.func @transform_5(%arg0: i32) -> (i32, i32) {
    %c0_i32 = arith.constant 0 : i32
    %c0_i32_0 = arith.constant 0 : i32
    %c0_i32_1 = arith.constant 0 : i32
    return %c0_i32, %c0_i32_0 : i32, i32
  }
  func.func @transform_6(%arg0: i32) -> (i32, i32) {
    %c0_i32 = arith.constant 0 : i32
    %c0_i32_0 = arith.constant 0 : i32
    %c0_i32_1 = arith.constant 0 : i32
    return %c0_i32, %c0_i32_0 : i32, i32
  }
  func.func @transform_7(%arg0: i32) -> (i32, i32) {
    %c0_i32 = arith.constant 0 : i32
    %c0_i32_0 = arith.constant 0 : i32
    %c0_i32_1 = arith.constant 0 : i32
    return %c0_i32, %c0_i32_0 : i32, i32
  }
  func.func @transform_8(%arg0: i32) -> (i32, i32) {
    %c0_i32 = arith.constant 0 : i32
    %c0_i32_0 = arith.constant 0 : i32
    %c0_i32_1 = arith.constant 0 : i32
    return %c0_i32, %c0_i32_0 : i32, i32
  }
  func.func @transform_9(%arg0: i32) -> (i32, i32) {
    %c0_i32 = arith.constant 0 : i32
    %c0_i32_0 = arith.constant 0 : i32
    %c0_i32_1 = arith.constant 0 : i32
    return %c0_i32, %c0_i32_0 : i32, i32
  }
  func.func @transform_10(%arg0: i32) -> (i32, i32, i32) {
    %c0_i32 = arith.constant 0 : i32
    %c0_i32_0 = arith.constant 0 : i32
    %c0_i32_1 = arith.constant 0 : i32
    return %arg0, %c0_i32, %c0_i32_0 : i32, i32, i32
  }
}

</mosaic_0001>

<bundles_post_ra>
// kernel: self_transformer_forward.73
= control target key start
LH: loop header
LB: loop body
LE: loop exit
PB: predicated region body
PF: predicated region fallthrough
CT: control target
= control target key end

     0   :  { %8 = vsyncpa [#allocation3], 0  ;;  %s675_s0 = inlined_call_operand.vmem [shape: f32[2,8,128], index: 0, kind: input, shape index: {}]   ;;  %s676_s1 = inlined_call_operand.vmem [shape: f32[128,128], index: 1, kind: input, shape index: {}]   ;;  %s677_s2 = inlined_call_operand.vmem [shape: f32[1,128], index: 2, kind: input, shape index: {}]   ;;  %s678_s3 = inlined_call_operand.hbm [shape: f32[2,8,128], index: 3, kind: output, shape index: {}]  }
   0x1   :  { %10 = vsyncpa [#allocation3 + $0x1], 0  ;;  %s537_s12 = smov 0   ;;  %s539_s13 = smov 0  }
   0x2   :  { %s541_s14 = smov 0   ;;  %s543_s15 = smov 0  }
   0x3 LB: > { %s558_s16 = sadd.s32 4294967295, %s512_s15   ;;  %s344_s17 = sadd.s32 4294967294, %s512_s15   ;;  %s512_s15 = sphi %s543_s15, %s684_s15   ;;  %s508_s14 = sphi %s541_s14, %s683_s14   ;;  %s504_s13 = sphi %s539_s13, %s682_s13   ;;  %s500_s12 = sphi %s537_s12, %s681_s12  }
   0x4   : > { %s562_s18 = sadd.s32 1, %s512_s15   ;;  %s91_s19 = sadd.s32 1, %s508_s14 }
   0x5   : > { %s88_s20 = ssub.s32 %s512_s15, %s562_s18  ;;  %p101_p0 = scmp.ne.s32.totalorder %s508_s14, %s504_s13 }
   0x6   : > { %p89_p1 = scmp.eq.s32.totalorder %s88_s20, 0  ;;  %p102_p2 = scmp.eq.s32.totalorder %s558_s16, 1 }
   0x7   : > { %p107_p3 = scmp.ne.s32.totalorder %s504_s13, %s500_s12  ;;  %p108_p4 = scmp.eq.s32.totalorder %s344_s17, 1 }
   0x8   : > { %s573_s21 = scalar_select %p89_p1, %s508_s14, %s91_s19  }
   0x9   : > { %p575_p5 = por %p102_p2, %p101_p0  ;;  %p579_p6 = por %p108_p4, %p107_p3 }
   0xa   : > { %p347_p7 = scmp.ge.s32.totalorder %s512_s15, 1  ;;  %p139_p8 = scmp.lt.s32.totalorder %s512_s15, 3 }
   0xc   : > { %p140_p9 = pnand %p347_p7, %p139_p8 }
   0xd   : > { %p162_p10 = scmp.lt.s32.totalorder (!%p140_p9), %s558_s16, 1  ;;  %s159_s27 = sand.u32 (!%p140_p9), 1, %s504_s13  }
   0xe   : > { %143 = sbr.rel (%p140_p9) target bundleno = 604 (0x25c), region = 32  ;;  %s348_s28 = sshll.u32 (!%p140_p9), %s159_s27, 3 }
   0xf   : > { %s352_s29 = sshll.u32 (!%p140_p9), %s558_s16, 7  ;;  %s161_s30 = scalar_lea.vmem (!%p140_p9), [#allocation2], %s348_s28 }
  0x10   : > { %s285_s4 = sshll.u32 (!%p140_p9), %s161_s30, 4  ;;  %s272_s8 = scalar_lea.sflag (!%p140_p9), [#allocation3], %s159_s27  ;;  %s286_s4 = int_to_ptr.vmem [resolvable:$true] %s285_s4 }
  0x11   : > { %s452_s9 = scalar_lea.vmem (!%p140_p9), %s286_s4, 128 }
  0x12   : > { %p453_p11 = scmp.ne.s32.totalorder (!%p140_p9), %s286_s4, %s452_s9 }
  0x13   : > { %v182_v0 = vld [vmem:[%s676_s1 + $0x78] sm:$0xff]  ;;  %v514_v1 = vmov 0.0   ;;  %vm515_vm0 = vmmov 0   ;;  %v181_v2 = vld [vmem:[%s676_s1 + $0x70] sm:$0xff]  ;;  %v180_v3 = vld [vmem:[%s676_s1 + $0x68] sm:$0xff]  ;;  %s163_s7 = scalar_select %p162_p10, %s558_s16, 1 }
  0x14   : > { %372 = vmatprep.subr.mxu0 %v514_v1  ;;  %404 = vmatprep.mubr.msk.f32.mxu0 %vm515_vm0, %v514_v1  ;;  %v179_v4 = vld [vmem:[%s676_s1 + $0x60] sm:$0xff]  ;;  %v178_v5 = vld [vmem:[%s676_s1 + $0x58] sm:$0xff]  ;;  %v177_v6 = vld [vmem:[%s676_s1 + $0x50] sm:$0xff]  ;;  %p454_p12 = pnand %p453_p11, %p575_p5 }
  0x15   : > { %373 = vmatpush3.xpose.msra.mxu0 %v182_v0  ;;  %v176_v7 = vld [vmem:[%s676_s1 + $0x48] sm:$0xff]  ;;  %v175_v8 = vld [vmem:[%s676_s1 + $0x40] sm:$0xff]  ;;  %v174_v9 = vld [vmem:[%s676_s1 + $0x38] sm:$0xff]  ;;  %s349_s10 = sshll.u32 %s163_s7, 3  ;;  %s283_s7 = scalar_lea.hbm %s678_s3, %s352_s29 }
  0x16   : > { %374 = vmatprep.subr.mxu0 %v514_v1  ;;  %v173_v10 = vld [vmem:[%s676_s1 + $0x30] sm:$0xff]  ;;  %v172_v11 = vld [vmem:[%s676_s1 + $0x28] sm:$0xff]  ;;  %v171_v12 = vld [vmem:[%s676_s1 + $0x20] sm:$0xff]  ;;  %s165_s24 = scalar_lea.vmem %s675_s0, %s349_s10  ;;  %p455_p13 = pneg %p454_p12 }
  0x17   : > { %v170_v13 = vld [vmem:[%s676_s1 + $0x18] sm:$0xff]  ;;  %v169_v14 = vld [vmem:[%s676_s1 + $0x10] sm:$0xff]  ;;  %v168_v15 = vld [vmem:[%s676_s1 + $0x8] sm:$0xff]  ;;  %s516_s10 = smov [#allocation2]  }
  0x18   : > { %v167_v16 = vld [vmem:[%s676_s1] sm:$0xff]  ;;  %s456_s11 = sshll.u32 %s516_s10, 4  ;;  %s457_s11 = int_to_ptr.vmem [resolvable:$false] %s456_s11 }
  0x19   : > { %375 = vmatpush3.xpose.msra.mxu0 %v181_v2  ;;  %v166_v17 = vld [vmem:[%s165_s24] sm:$0xff]  ;;  %s458_s16 = scalar_lea.vmem %s457_s11, 256  ;;  %p459_p0 = scmp.lt.s32.totalorder %s286_s4, %s457_s11 }
  0x1a   : > { %376 = vmatprep.subr.mxu0 %v514_v1  ;;  %v350_v18 = vld [vmem:[%s677_s2] ss:$0 sm:$0xff]  ;;  %p460_p1 = scmp.lt.s32.totalorder %s458_s16, %s452_s9 }
  0x1c   : > { %p461_p2 = por %p460_p1, %p459_p0 }
  0x1d   : > { %377 = vmatpush3.xpose.msra.mxu0 %v180_v3 }
  0x1e   : > { %378 = vmatprep.subr.mxu0 %v514_v1  ;;  %p462_p3 = pnand %p461_p2, %p455_p13 }
  0x21   : > { %379 = vmatpush3.xpose.msra.mxu0 %v179_v4 }
  0x22   : > { %380 = vmatprep.subr.mxu0 %v514_v1 }
  0x25   : > { %381 = vmatpush3.xpose.msra.mxu0 %v178_v5 }
  0x26   : > { %382 = vmatprep.subr.mxu0 %v514_v1 }
  0x29   : > { %383 = vmatpush3.xpose.msra.mxu0 %v177_v6 }
  0x2a   : > { %384 = vmatprep.subr.mxu0 %v514_v1 }
  0x2d   : > { %385 = vmatpush3.xpose.msra.mxu0 %v176_v7 }
  0x2e   : > { %386 = vmatprep.subr.mxu0 %v514_v1 }
  0x31   : > { %387 = vmatpush3.xpose.msra.mxu0 %v175_v8 }
  0x32   : > { %388 = vmatprep.subr.mxu0 %v514_v1 }
  0x35   : > { %389 = vmatpush3.xpose.msra.mxu0 %v174_v9 }
  0x36   : > { %390 = vmatprep.subr.mxu0 %v514_v1 }
  0x39   : > { %391 = vmatpush3.xpose.msra.mxu0 %v173_v10 }
  0x3a   : > { %392 = vmatprep.subr.mxu0 %v514_v1 }
  0x3d   : > { %393 = vmatpush3.xpose.msra.mxu0 %v172_v11 }
  0x3e   : > { %394 = vmatprep.subr.mxu0 %v514_v1 }
  0x41   : > { %395 = vmatpush3.xpose.msra.mxu0 %v171_v12 }
  0x42   : > { %396 = vmatprep.subr.mxu0 %v514_v1 }
  0x45   : > { %397 = vmatpush3.xpose.msra.mxu0 %v170_v13 }
  0x46   : > { %398 = vmatprep.subr.mxu0 %v514_v1 }
  0x49   : > { %399 = vmatpush3.xpose.msra.mxu0 %v169_v14 }
  0x4a   : > { %400 = vmatprep.subr.mxu0 %v514_v1 }
  0x4d   : > { %401 = vmatpush3.xpose.msra.mxu0 %v168_v15 }
  0x4e   : > { %402 = vmatprep.subr.mxu0 %v514_v1 }
  0x51   : > { %403 = vmatpush3.xpose.msra.mxu0 %v167_v16 }
  0x54   : > { %405 = vmatmul.mubr.f32.vlgmr.msra.gmra.mxu0 %v166_v17 }
 0x114   : > { %v256_v19 = vpop.f32.mrf.mxu0 }
 0x115   : > { %v257_v20 = vadd.f32 %v350_v18, %v256_v19 }
 0x116   : > { %v406_v21 = vpop.f32.mrf.mxu0 }
 0x117   : > { %260 = vmax.xlane.f32.xlu0 %v257_v20 }
 0x1a0   : > { %v261_v22 = vpop.xlane.xlu0 %260 }
 0x1a1   : > { %v262_v23 = vsub.f32 %v257_v20, %v261_v22 }
 0x1a3   : > { %v263_v24 = vmul.f32 1.442695, %v262_v23 }
 0x1a5   : > { %448 = vpow2.f32 %v263_v24 }
 0x1b2   : > { %v449_v25 = vpop.eup %448 }
 0x1b3   : > { %265 = vadd.xlane.f32.xlu0 %v449_v25 }
 0x23c   : > { %v266_v26 = vpop.xlane.xlu0 %265 }
 0x23d   : > { %450 = vlog2.f32 %v266_v26 }
 0x24a   : > { %v451_v27 = vpop.eup %450 }
 0x24b   : > { %v268_v28 = vmul.f32 0.6931472, %v451_v27 }
 0x24d   : > { %v269_v29 = vsub.f32 %v262_v23, %v268_v28 }
 0x24f   : > { %270 = vst [vmem:[%s161_s30] sm:$0xff] %v269_v29 }
 0x250   : > { %465 = shalt.err (!%p462_p3)
}
 0x251   : > { %s466_s17 = scalar_lea.hbm %s283_s7, 128  ;;  %s470_s24 = scalar_lea.hbm %s678_s3, 256 }
 0x252   : > { %p467_p4 = scmp.ne.s32.totalorder %s283_s7, %s466_s17  ;;  %p471_p9 = scmp.lt.s32.totalorder %s283_s7, %s678_s3 }
 0x253   : > { %p472_p10 = scmp.lt.s32.totalorder %s470_s24, %s466_s17 }
 0x254   : > { %p468_p7 = pnand %p467_p4, %p575_p5 }
 0x255   : > { %p473_p11 = por %p472_p10, %p471_p9 }
 0x256   : > { %p469_p8 = pneg %p468_p7 }
 0x258   : > { %p474_p12 = pnand %p473_p11, %p469_p8 }
 0x25a   : > { %477 = shalt.err (!%p474_p12)
}
 0x25b   : > { %407 = dma.vmem_to_hbm [thread:$0]  (%p575_p5), %s286_s4, 128, %s283_s7, %s272_s8  }
 0x25c PF: > { %p413_p13 = scmp.ge.s32.totalorder %s512_s15, 2  ;;  %s297_s27 = sand.u32 1, %s500_s12  }
 0x25d   : > { %s298_s28 = scalar_lea.sflag [#allocation3], %s297_s27 }
 0x25e   : > { %p410_p0 = pnand %p413_p13, %p579_p6 }
 0x260   : > { %p411_p1 = pneg %p410_p0 }
 0x262   : > { %495 = dma.done.wait (%p411_p1), %s298_s28, 128  }
 0x263   : > { %497 = vsyncadd (%p411_p1), %s298_s28, 4294967168  ;;  %p13_p2 = scmp.ge.s32.totalorder %s562_s18, 4   ;;  %s681_s12 = smov %s504_s13 }
 0x264   : > { %s682_s13 = smov %s508_s14  ;;  %s683_s14 = smov %s573_s21 }
 0x265   : > { %s684_s15 = smov %s562_s18  ;;  %15 = sbr.rel (!%p13_p2) target bundleno = 3 (0x3), region = 67 }
 0x26a   :  { %303 = vsyncpa [#allocation3], 1 }
 0x26b   :  { %305 = vsyncpa [#allocation3 + $0x1], 1 }

// kernel: self_transformer_forward.38
= control target key start
LH: loop header
LB: loop body
LE: loop exit
PB: predicated region body
PF: predicated region fallthrough
CT: control target
= control target key end

     0   :  { %s783_s30 = smov 0   ;;  %s1027_s0 = inlined_call_operand.vmem [shape: f32[2,8,128], index: 0, kind: input, shape index: {}]   ;;  %s1028_s1 = inlined_call_operand.vmem [shape: f32[1,128], index: 1, kind: input, shape index: {}]   ;;  %s1029_s2 = inlined_call_operand.vmem [shape: f32[1,128], index: 2, kind: input, shape index: {}]   ;;  %s1030_s3 = inlined_call_operand.vmem [shape: f32[256,128], index: 3, kind: input, shape index: {}]   ;;  %s1031_s4 = inlined_call_operand.vmem [shape: f32[1,256], index: 4, kind: input, shape index: {}]   ;;  %s1032_s5 = inlined_call_operand.vmem [shape: f32[128,256], index: 5, kind: input, shape index: {}]   ;;  %s1033_s6 = inlined_call_operand.vmem [shape: f32[1,128], index: 6, kind: input, shape index: {}]   ;;  %s1034_s7 = inlined_call_operand.vmem [shape: f32[1,128], index: 7, kind: input, shape index: {}]   ;;  %s1035_s8 = inlined_call_operand.vmem [shape: f32[1,128], index: 8, kind: input, shape index: {}]   ;;  %s1036_s9 = inlined_call_operand.vmem [shape: f32[2,8,128], index: 9, kind: output, shape index: {}]  }
   0x1 LB: > { %s665_s10 = sadd.s32 4294967295, %s731_s30   ;;  %p669_p0 = scmp.ge.s32.totalorder %s731_s30, 1  ;;  %s731_s30 = sphi %s783_s30, %s19_s30  }
   0x2   : > { %p286_p1 = scmp.lt.s32.totalorder %s731_s30, 3 }
   0x4   : > { %p287_p2 = pnand %p669_p0, %p286_p1 }
   0x5   : > { %p320_p3 = scmp.lt.s32.totalorder (!%p287_p2), %s665_s10, 1 }
   0x6   : > { %290 = sbr.rel (%p287_p2) target bundleno = 1026 (0x402), region = 56 }
   0xb   : > { %s1038_s10 = smov (!%p320_p3, %s665_s10), 1  ;;  %v388_v1 = vld [vmem:[%s1030_s3 + $0xf8] sm:$0xff]  ;;  %v387_v3 = vld [vmem:[%s1030_s3 + $0xf0] sm:$0xff]  ;;  %v386_v5 = vld [vmem:[%s1030_s3 + $0xe8] sm:$0xff] }
   0xc   : > { %s670_s11 = sshll.u32 %s1038_s10, 3  ;;  %v372_v2 = vld [vmem:[%s1030_s3 + $0x78] sm:$0xff]  ;;  %679 = vmatprep.subr.mxu0 %v388_v1  ;;  %v371_v4 = vld [vmem:[%s1030_s3 + $0x70] sm:$0xff]  ;;  %v370_v6 = vld [vmem:[%s1030_s3 + $0x68] sm:$0xff] }
   0xd   : > { %s323_s14 = scalar_lea.vmem %s1027_s0, %s670_s11  ;;  %680 = vmatpush3.xpose.msra.mxu0 %v372_v2  ;;  %v385_v7 = vld [vmem:[%s1030_s3 + $0xe0] sm:$0xff]  ;;  %v384_v9 = vld [vmem:[%s1030_s3 + $0xd8] sm:$0xff]  ;;  %v383_v11 = vld [vmem:[%s1030_s3 + $0xd0] sm:$0xff]  ;;  %s327_s13 = scalar_lea.vmem %s1036_s9, %s670_s11 }
   0xe   : > { %v799_v0 = vld [vmem:[%s323_s14] sm:$0xff]  ;;  %681 = vmatprep.subr.mxu0 %v387_v3  ;;  %v368_v10 = vld [vmem:[%s1030_s3 + $0x58] sm:$0xff]  ;;  %v367_v12 = vld [vmem:[%s1030_s3 + $0x50] sm:$0xff] }
   0xf   : > { %331 = vadd.xlane.f32.xlu0 %v799_v0  ;;  %v369_v8 = vld [vmem:[%s1030_s3 + $0x60] sm:$0xff]  ;;  %v382_v13 = vld [vmem:[%s1030_s3 + $0xc8] sm:$0xff]  ;;  %v380_v17 = vld [vmem:[%s1030_s3 + $0xb8] sm:$0xff] }
  0x10   : > { %v366_v14 = vld [vmem:[%s1030_s3 + $0x48] sm:$0xff]  ;;  %v381_v15 = vld [vmem:[%s1030_s3 + $0xc0] sm:$0xff]  ;;  %v364_v18 = vld [vmem:[%s1030_s3 + $0x38] sm:$0xff] }
  0x11   : > { %682 = vmatpush3.xpose.msra.mxu0 %v371_v4  ;;  %v365_v16 = vld [vmem:[%s1030_s3 + $0x40] sm:$0xff]  ;;  %v379_v19 = vld [vmem:[%s1030_s3 + $0xb0] sm:$0xff]  ;;  %v378_v25 = vld [vmem:[%s1030_s3 + $0xa8] sm:$0xff] }
  0x12   : > { %683 = vmatprep.subr.mxu0 %v386_v5  ;;  %v363_v20 = vld [vmem:[%s1030_s3 + $0x30] sm:$0xff]  ;;  %v362_v26 = vld [vmem:[%s1030_s3 + $0x28] sm:$0xff]  ;;  %v377_v27 = vld [vmem:[%s1030_s3 + $0xa0] sm:$0xff] }
  0x13   : > { %v361_v28 = vld [vmem:[%s1030_s3 + $0x20] sm:$0xff]  ;;  %v376_v29 = vld [vmem:[%s1030_s3 + $0x98] sm:$0xff]  ;;  %v375_v31 = vld [vmem:[%s1030_s3 + $0x90] sm:$0xff] }
  0x14   : > { %v360_v30 = vld [vmem:[%s1030_s3 + $0x18] sm:$0xff]  ;;  %v359_v32 = vld [vmem:[%s1030_s3 + $0x10] sm:$0xff]  ;;  %v374_v33 = vld [vmem:[%s1030_s3 + $0x88] sm:$0xff] }
  0x15   : > { %684 = vmatpush3.xpose.msra.mxu0 %v370_v6  ;;  %v358_v34 = vld [vmem:[%s1030_s3 + $0x8] sm:$0xff]  ;;  %v373_v35 = vld [vmem:[%s1030_s3 + $0x80] sm:$0xff]  ;;  %v505_v37 = vld [vmem:[%s1032_s5 + $0xf8] sm:$0xff] }
  0x16   : > { %685 = vmatprep.subr.mxu0 %v385_v7  ;;  %v357_v36 = vld [vmem:[%s1030_s3] sm:$0xff]  ;;  %v504_v38 = vld [vmem:[%s1032_s5 + $0xf0] sm:$0xff]  ;;  %v503_v39 = vld [vmem:[%s1032_s5 + $0xe8] sm:$0xff]  ;;  %513 = vmatprep.subr.mxu1 %v505_v37 }
  0x17   : > { %514 = vmatpush1.xpose.msra.mxu1 %v504_v38  ;;  %v502_v40 = vld [vmem:[%s1032_s5 + $0xe0] sm:$0xff]  ;;  %v501_v41 = vld [vmem:[%s1032_s5 + $0xd8] sm:$0xff]  ;;  %v500_v42 = vld [vmem:[%s1032_s5 + $0xd0] sm:$0xff] }
  0x18   : > { %515 = vmatprep.subr.mxu1 %v503_v39  ;;  %v499_v43 = vld [vmem:[%s1032_s5 + $0xc8] sm:$0xff]  ;;  %v498_v44 = vld [vmem:[%s1032_s5 + $0xc0] sm:$0xff]  ;;  %v497_v45 = vld [vmem:[%s1032_s5 + $0xb8] sm:$0xff] }
  0x19   : > { %686 = vmatpush3.xpose.msra.mxu0 %v369_v8  ;;  %v496_v46 = vld [vmem:[%s1032_s5 + $0xb0] sm:$0xff]  ;;  %v495_v47 = vld [vmem:[%s1032_s5 + $0xa8] sm:$0xff]  ;;  %v494_v48 = vld [vmem:[%s1032_s5 + $0xa0] sm:$0xff] }
  0x1a   : > { %687 = vmatprep.subr.mxu0 %v384_v9  ;;  %v493_v49 = vld [vmem:[%s1032_s5 + $0x98] sm:$0xff]  ;;  %v492_v50 = vld [vmem:[%s1032_s5 + $0x90] sm:$0xff]  ;;  %v491_v51 = vld [vmem:[%s1032_s5 + $0x88] sm:$0xff] }
  0x1b   : > { %516 = vmatpush1.xpose.msra.mxu1 %v502_v40  ;;  %v490_v52 = vld [vmem:[%s1032_s5 + $0x80] sm:$0xff]  ;;  %v489_v53 = vld [vmem:[%s1032_s5 + $0x78] sm:$0xff]  ;;  %v488_v54 = vld [vmem:[%s1032_s5 + $0x70] sm:$0xff] }
  0x1c   : > { %517 = vmatprep.subr.mxu1 %v501_v41  ;;  %v487_v55 = vld [vmem:[%s1032_s5 + $0x68] sm:$0xff]  ;;  %v486_v56 = vld [vmem:[%s1032_s5 + $0x60] sm:$0xff]  ;;  %v485_v57 = vld [vmem:[%s1032_s5 + $0x58] sm:$0xff] }
  0x1d   : > { %688 = vmatpush3.xpose.msra.mxu0 %v368_v10  ;;  %v484_v58 = vld [vmem:[%s1032_s5 + $0x50] sm:$0xff]  ;;  %v483_v59 = vld [vmem:[%s1032_s5 + $0x48] sm:$0xff]  ;;  %v482_v60 = vld [vmem:[%s1032_s5 + $0x40] sm:$0xff] }
  0x1e   : > { %689 = vmatprep.subr.mxu0 %v383_v11  ;;  %v481_v61 = vld [vmem:[%s1032_s5 + $0x38] sm:$0xff]  ;;  %v480_v62 = vld [vmem:[%s1032_s5 + $0x30] sm:$0xff]  ;;  %v479_v63 = vld [vmem:[%s1032_s5 + $0x28] sm:$0xff] }
  0x1f   : > { %518 = vmatpush1.xpose.msra.mxu1 %v500_v42  ;;  %v478_v1 = vld [vmem:[%s1032_s5 + $0x20] sm:$0xff]  ;;  %v477_v11 = vld [vmem:[%s1032_s5 + $0x18] sm:$0xff] }
  0x20   : > { %519 = vmatprep.subr.mxu1 %v499_v43  ;;  %v672_v6 = vld [vmem:[%s1028_s1] ss:$0 sm:$0xff] }
  0x21   : > { %690 = vmatpush3.xpose.msra.mxu0 %v367_v12  ;;  %v673_v8 = vld [vmem:[%s1029_s2] ss:$0 sm:$0xff]  ;;  %v476_v12 = vld [vmem:[%s1032_s5 + $0x10] sm:$0xff] }
  0x22   : > { %691 = vmatprep.subr.mxu0 %v382_v13  ;;  %v475_v13 = vld [vmem:[%s1032_s5 + $0x8] sm:$0xff]  ;;  %v675_v41 = vld [vmem:[%s1034_s7] ss:$0 sm:$0xff] }
  0x23   : > { %520 = vmatpush1.xpose.msra.mxu1 %v498_v44 }
  0x24   : > { %521 = vmatprep.subr.mxu1 %v497_v45 }
  0x25   : > { %692 = vmatpush3.xpose.msra.mxu0 %v366_v14  ;;  %v474_v14 = vld [vmem:[%s1032_s5] sm:$0xff] }
  0x26   : > { %693 = vmatprep.subr.mxu0 %v381_v15  ;;  %v391_v15 = vlaneseq }
  0x27   : > { %522 = vmatpush1.xpose.msra.mxu1 %v496_v46 }
  0x28   : > { %523 = vmatprep.subr.mxu1 %v495_v47 }
  0x29   : > { %694 = vmatpush3.xpose.msra.mxu0 %v365_v16  ;;  %v392_v16 = vshrl.u32 %v391_v15, 7 }
  0x2a   : > { %695 = vmatprep.subr.mxu0 %v380_v17 }
  0x2b   : > { %524 = vmatpush1.xpose.msra.mxu1 %v494_v48  ;;  %v393_v17 = vsub.s32 0, %v392_v16 }
  0x2c   : > { %525 = vmatprep.subr.mxu1 %v493_v49 }
  0x2d   : > { %696 = vmatpush3.xpose.msra.mxu0 %v364_v18  ;;  %v389_v18 = vld [vmem:[%s1031_s4] sm:$0x3] }
  0x2e   : > { %697 = vmatprep.subr.mxu0 %v379_v19  ;;  %v397_v19 = vsub.s32 1, %v392_v16 }
  0x2f   : > { %526 = vmatpush1.xpose.msra.mxu1 %v492_v50 }
  0x30   : > { %527 = vmatprep.subr.mxu1 %v491_v51 }
  0x31   : > { %698 = vmatpush3.xpose.msra.mxu0 %v363_v20  ;;  %v394_v20 = vrot.slane %v389_v18, %v393_v17 }
  0x32   : > { %699 = vmatprep.subr.mxu0 %v378_v25 }
  0x33   : > { %528 = vmatpush1.xpose.msra.mxu1 %v490_v52 }
  0x34   : > { %529 = vmatprep.subr.mxu1 %v489_v53 }
  0x35   : > { %700 = vmatpush3.xpose.msra.mxu0 %v362_v26 }
  0x36   : > { %701 = vmatprep.subr.mxu0 %v377_v27 }
  0x37   : > { %530 = vmatpush1.xpose.msra.mxu1 %v488_v54 }
  0x38   : > { %531 = vmatprep.subr.mxu1 %v487_v55 }
  0x39   : > { %702 = vmatpush3.xpose.msra.mxu0 %v361_v28  ;;  %v674_v28 = vld [vmem:[%s1033_s6] ss:$0 sm:$0xff] }
  0x3a   : > { %703 = vmatprep.subr.mxu0 %v376_v29 }
  0x3b   : > { %532 = vmatpush1.xpose.msra.mxu1 %v486_v56 }
  0x3c   : > { %533 = vmatprep.subr.mxu1 %v485_v57 }
  0x3d   : > { %704 = vmatpush3.xpose.msra.mxu0 %v360_v30 }
  0x3e   : > { %705 = vmatprep.subr.mxu0 %v375_v31 }
  0x3f   : > { %534 = vmatpush1.xpose.msra.mxu1 %v484_v58 }
  0x40   : > { %535 = vmatprep.subr.mxu1 %v483_v59 }
  0x41   : > { %706 = vmatpush3.xpose.msra.mxu0 %v359_v32 }
  0x42   : > { %707 = vmatprep.subr.mxu0 %v374_v33 }
  0x43   : > { %536 = vmatpush1.xpose.msra.mxu1 %v482_v60 }
  0x44   : > { %537 = vmatprep.subr.mxu1 %v481_v61 }
  0x45   : > { %708 = vmatpush3.xpose.msra.mxu0 %v358_v34 }
  0x46   : > { %709 = vmatprep.subr.mxu0 %v373_v35 }
  0x47   : > { %538 = vmatpush1.xpose.msra.mxu1 %v480_v62 }
  0x48   : > { %539 = vmatprep.subr.mxu1 %v479_v63 }
  0x49   : > { %710 = vmatpush3.xpose.msra.mxu0 %v357_v36 }
  0x4b   : > { %540 = vmatpush1.xpose.msra.mxu1 %v478_v1 }
  0x4c   : > { %541 = vmatprep.subr.mxu1 %v477_v11 }
  0x4f   : > { %542 = vmatpush1.xpose.msra.mxu1 %v476_v12 }
  0x50   : > { %543 = vmatprep.subr.mxu1 %v475_v13 }
  0x53   : > { %544 = vmatpush1.xpose.msra.mxu1 %v474_v14 }
  0x98   : > { %v332_v21 = vpop.xlane.xlu0 %331 }
  0x99   : > { %v334_v22 = vmul.f32 0.0078125, %v332_v21  ;;  %v398_v21 = vrot.slane %v389_v18, %v397_v19 }
  0x9b   : > { %v863_v23 = vsub.f32 %v799_v0, %v334_v22 }
  0x9d   : > { %v336_v24 = vmul.f32 %v863_v23, %v863_v23 }
  0x9f   : > { %337 = vadd.xlane.f32.xlu0 %v336_v24 }
 0x128   : > { %v338_v2 = vpop.xlane.xlu0 %337 }
 0x129   : > { %v339_v3 = vmul.f32 0.0078125, %v338_v2 }
 0x12b   : > { %v340_v4 = vadd.f32 1e-05, %v339_v3 }
 0x12d   : > { %721 = vrsqrt.f32 %v340_v4 }
 0x13a   : > { %v722_v5 = vpop.eup %721 }
 0x13b   : > { %v342_v7 = vmul.f32 %v722_v5, %v863_v23 }
 0x13d   : > { %v349_v9 = vmul.f32 %v672_v6, %v342_v7 }
 0x13f   : > { %v356_v10 = vadd.f32 %v673_v8, %v349_v9 }
 0x141   : > { %711 = vmatprep.mubr.f32.mxu0 %v356_v10 }
 0x142   : > { %712 = vmatmul.mubr.f32.vlgmr.msra.gmra.mxu0 %v356_v10 }
 0x202   : > { %v467_v22 = vpop.f32.mrf.mxu0 }
 0x203   : > { %v468_v23 = vadd.f32 %v467_v22, %v394_v20 }
 0x204   : > { %v469_v24 = vpop.f32.mrf.mxu0 }
 0x205   : > { %v470_v25 = vadd.f32 %v469_v24, %v398_v21  ;;  %v472_v27 = vmax.f32 %v468_v23, 0.0 }
 0x207   : > { %v473_v26 = vmax.f32 %v470_v25, 0.0 }
 0x209   : > { %577 = vmatprep.mubr.f32.mxu1 %v473_v26 }
 0x20a   : > { %578 = vmatmul.mubr.f32.vlgmr.msra.gmra.mxu1 %v472_v27 }
 0x2ca   : > { %v579_v29 = vpop.f32.mrf.mxu1 }
 0x2cb   : > { %v580_v30 = vadd.f32 %v674_v28, %v579_v29 }
 0x2cc   : > { %v581_v31 = vpop.f32.mrf.mxu1 }
 0x2cd   : > { %v583_v32 = vadd.f32 %v580_v30, %v799_v0  ;;  %v676_v0 = vld [vmem:[%s1035_s8] ss:$0 sm:$0xff] }
 0x2cf   : > { %586 = vadd.xlane.f32.xlu1 %v583_v32 }
 0x358   : > { %v587_v33 = vpop.xlane.xlu1 %586 }
 0x359   : > { %v588_v34 = vmul.f32 0.0078125, %v587_v33 }
 0x35b   : > { %v589_v35 = vsub.f32 %v583_v32, %v588_v34 }
 0x35d   : > { %v590_v36 = vmul.f32 %v589_v35, %v589_v35 }
 0x35f   : > { %591 = vadd.xlane.f32.xlu1 %v590_v36 }
 0x3e8   : > { %v592_v37 = vpop.xlane.xlu1 %591 }
 0x3e9   : > { %v593_v38 = vmul.f32 0.0078125, %v592_v37 }
 0x3eb   : > { %v594_v39 = vadd.f32 1e-05, %v593_v38 }
 0x3ed   : > { %723 = vrsqrt.f32 %v594_v39 }
 0x3fa   : > { %v724_v40 = vpop.eup %723 }
 0x3fb   : > { %v596_v42 = vmul.f32 %v724_v40, %v589_v35 }
 0x3fd   : > { %v603_v43 = vmul.f32 %v675_v41, %v596_v42 }
 0x3ff   : > { %v610_v44 = vadd.f32 %v676_v0, %v603_v43 }
 0x401   : > { %611 = vst [vmem:[%s327_s13] sm:$0xff] %v610_v44 }
 0x402 PF: > { %s19_s30 = sadd.s32 1, %s731_s30  }
 0x403   : > { %p16_p4 = scmp.ge.s32.totalorder %s19_s30, 4  }
 0x405   :  { %18 = sbr.rel (!%p16_p4) target bundleno = 1 (0x1), region = 86 }

// kernel: self_transformer_forward.37
= control target key start
LH: loop header
LB: loop body
LE: loop exit
PB: predicated region body
PF: predicated region fallthrough
CT: control target
= control target key end

     0   :  { %s2788_s13 = smov 0   ;;  %s3199_s0 = inlined_call_operand.vmem [shape: f32[2,8,128], index: 0, kind: input, shape index: {}, may-alias: {0,1}]   ;;  %s3200_s1 = inlined_call_operand.vmem [shape: f32[2,8,128], index: 1, kind: input, shape index: {}, may-alias: {0,1}]   ;;  %s3201_s2 = inlined_call_operand.vmem [shape: f32[2,8,8], index: 2, kind: input, shape index: {}]   ;;  %s3202_s3 = inlined_call_operand.vmem [shape: f32[128,128], index: 3, kind: input, shape index: {}]   ;;  %s3203_s4 = inlined_call_operand.vmem [shape: f32[128,128], index: 4, kind: input, shape index: {}]   ;;  %s3204_s5 = inlined_call_operand.vmem [shape: f32[128,128], index: 5, kind: input, shape index: {}]   ;;  %s3205_s6 = inlined_call_operand.vmem [shape: f32[128,128], index: 6, kind: input, shape index: {}]   ;;  %s3206_s7 = inlined_call_operand.vmem [shape: f32[1,128], index: 7, kind: input, shape index: {}]   ;;  %s3207_s8 = inlined_call_operand.vmem [shape: f32[1,128], index: 8, kind: input, shape index: {}]   ;;  %s3208_s9 = inlined_call_operand.vmem [shape: f32[1,128], index: 9, kind: input, shape index: {}]   ;;  %s3209_s10 = inlined_call_operand.vmem [shape: f32[2,8,128], index: 10, kind: output, shape index: {}]  }
   0x1 LB: > { %s2353_s14 = sadd.s32 4294967295, %s2729_s13   ;;  %p2357_p0 = scmp.ge.s32.totalorder %s2729_s13, 1  ;;  %s2729_s13 = sphi %s2788_s13, %s20_s13  }
   0x2   : > { %p329_p1 = scmp.lt.s32.totalorder %s2729_s13, 3 }
   0x4   : > { %p330_p2 = pnand %p2357_p0, %p329_p1 }
   0x5   : > { %p373_p3 = scmp.lt.s32.totalorder (!%p330_p2), %s2353_s14, 1 }
   0x6   : > { %333 = sbr.rel (%p330_p2) target bundleno = 3963 (0xf7b), region = 60 }
   0xb   : > { %v470_v0 = vld [vmem:[%s3203_s4 + $0x18] sm:$0xff]  ;;  %v2731_v2 = vmov 0.0   ;;  %s3211_s14 = smov (!%p373_p3, %s2353_s14), 1  ;;  %v469_v3 = vld [vmem:[%s3203_s4 + $0x10] sm:$0xff]  ;;  %vm2732_vm0 = vmmov 0   ;;  %v468_v5 = vld [vmem:[%s3203_s4 + $0x8] sm:$0xff] }
   0xc   : > { %v396_v1 = vld [vmem:[%s3202_s3 + $0x18] sm:$0xff]  ;;  %2490 = vmatprep.subr.mxu1 %v2731_v2  ;;  %2479 = vmatprep.subr.mxu0 %v2731_v2  ;;  %v395_v4 = vld [vmem:[%s3202_s3 + $0x10] sm:$0xff]  ;;  %s2816_s23 = sshll.u32 %s3211_s14, 3  ;;  %v394_v6 = vld [vmem:[%s3202_s3 + $0x8] sm:$0xff]  ;;  %vm615_vm1 = vcmask 261120   ;;  %vm694_vm3 = vcmask 64512  }
   0xd   : > { %2491 = vmatpush3.xpose.msra.mxu1 %v470_v0  ;;  %2480 = vmatpush3.xpose.msra.mxu0 %v396_v1  ;;  %s376_s30 = scalar_lea.vmem %s3199_s0, %s2816_s23  ;;  %v467_v8 = vld [vmem:[%s3203_s4] sm:$0xff]  ;;  %s380_s18 = scalar_lea.vmem %s3200_s1, %s2816_s23  ;;  %v544_v16 = vld [vmem:[%s3204_s5 + $0x18] sm:$0xff]  ;;  %v543_v17 = vld [vmem:[%s3204_s5 + $0x10] sm:$0xff] }
   0xe   : > { %2492 = vmatprep.subr.mxu1 %v2731_v2  ;;  %2481 = vmatprep.subr.mxu0 %v2731_v2  ;;  %v2830_v7 = vld [vmem:[%s376_s30] sm:$0xff]  ;;  %v542_v18 = vld [vmem:[%s3204_s5 + $0x8] sm:$0xff]  ;;  %s384_s30 = scalar_lea.vmem %s3201_s2, %s2816_s23  ;;  %v860_v31 = vld [vmem:[%s3203_s4 + $0x38] sm:$0xff]  ;;  %s388_s16 = scalar_lea.vmem %s3209_s10, %s2816_s23 }
   0xf   : > { %2498 = vmatprep.mubr.msk.f32.mxu1 %vm2732_vm0, %v2731_v2  ;;  %2487 = vmatprep.mubr.msk.f32.mxu0 %vm2732_vm0, %v2731_v2  ;;  %v393_v9 = vld [vmem:[%s3202_s3] sm:$0xff]  ;;  %v2845_v10 = vmul.f32 0.17677669, %v2830_v7  ;;  %v859_v33 = vld [vmem:[%s3203_s4 + $0x30] sm:$0xff]  ;;  %v858_v34 = vld [vmem:[%s3203_s4 + $0x28] sm:$0xff] }
  0x10   : > { %v2847_v11 = vld [vmem:[%s380_s18] sm:$0xff]  ;;  %v786_v39 = vld [vmem:[%s3202_s3 + $0x38] sm:$0xff]  ;;  %v785_v40 = vld [vmem:[%s3202_s3 + $0x30] sm:$0xff] }
  0x11   : > { %2493 = vmatpush3.xpose.msra.mxu1 %v469_v3  ;;  %2482 = vmatpush3.xpose.msra.mxu0 %v395_v4  ;;  %v541_v19 = vld [vmem:[%s3204_s5] sm:$0xff]  ;;  %v784_v41 = vld [vmem:[%s3202_s3 + $0x28] sm:$0xff]  ;;  %v934_v43 = vld [vmem:[%s3204_s5 + $0x38] sm:$0xff] }
  0x12   : > { %2494 = vmatprep.subr.mxu1 %v2731_v2  ;;  %2483 = vmatprep.subr.mxu0 %v2731_v2  ;;  %v2885_v20 = vld [vmem:[%s384_s30] sm:$0xff]  ;;  %v933_v44 = vld [vmem:[%s3204_s5 + $0x30] sm:$0xff]  ;;  %v932_v45 = vld [vmem:[%s3204_s5 + $0x28] sm:$0xff] }
  0x13   : > { %vm692_vm2 = vcmp.eq.f32.partialorder %v2885_v20, 0.0  ;;  %v857_v35 = vld [vmem:[%s3203_s4 + $0x20] sm:$0xff]  ;;  %v782_v47 = vld [vmem:[%s3205_s6 + $0x18] sm:$0xff]  ;;  %v781_v48 = vld [vmem:[%s3205_s6 + $0x10] sm:$0xff] }
  0x14   : > { %v783_v42 = vld [vmem:[%s3202_s3 + $0x20] sm:$0xff]  ;;  %v780_v49 = vld [vmem:[%s3205_s6 + $0x8] sm:$0xff] }
  0x15   : > { %2495 = vmatpush3.xpose.msra.mxu1 %v468_v5  ;;  %2484 = vmatpush3.xpose.msra.mxu0 %v394_v6  ;;  %v931_v46 = vld [vmem:[%s3204_s5 + $0x20] sm:$0xff] }
  0x16   : > { %2496 = vmatprep.subr.mxu1 %v2731_v2  ;;  %2485 = vmatprep.subr.mxu0 %v2731_v2  ;;  %v779_v50 = vld [vmem:[%s3205_s6] sm:$0xff] }
  0x19   : > { %2497 = vmatpush3.xpose.msra.mxu1 %v467_v8  ;;  %2486 = vmatpush3.xpose.msra.mxu0 %v393_v9  ;;  %v1393_v8 = vld [vmem:[%s3203_s4 + $0x58] sm:$0xff] }
  0x1a   : > { %2512 = vmatprep.subr.mxu1 %v2731_v2  ;;  %2501 = vmatprep.subr.mxu0 %v2731_v2 }
  0x1c   : > { %2499 = vmatmul.mubr.f32.vlgmr.msra.gmra.mxu1 %v2847_v11  ;;  %2488 = vmatmul.mubr.f32.vlgmr.msra.gmra.mxu0 %v2845_v10 }
  0x1d   : > { %2514 = vmatprep.mubr.msk.f32.mxu1 %vm2732_vm0, %v2731_v2  ;;  %2509 = vmatprep.mubr.msk.f32.mxu0 %vm2732_vm0, %v2731_v2 }
  0x1e   : > { %2502 = vmatpush3.xpose.msra.mxu0 %v544_v16  ;;  %v1167_v16 = vld [vmem:[%s3205_s6 + $0x28] sm:$0xff] }
  0x1f   : > { %2503 = vmatprep.subr.mxu0 %v2731_v2 }
  0x22   : > { %2504 = vmatpush3.xpose.msra.mxu0 %v543_v17  ;;  %v1166_v17 = vld [vmem:[%s3205_s6 + $0x20] sm:$0xff] }
  0x23   : > { %2505 = vmatprep.subr.mxu0 %v2731_v2 }
  0x26   : > { %2506 = vmatpush3.xpose.msra.mxu0 %v542_v18  ;;  %v1392_v18 = vld [vmem:[%s3203_s4 + $0x50] sm:$0xff] }
  0x27   : > { %2507 = vmatprep.subr.mxu0 %v2731_v2 }
  0x2a   : > { %2508 = vmatpush3.xpose.msra.mxu0 %v541_v19  ;;  %v1391_v19 = vld [vmem:[%s3203_s4 + $0x48] sm:$0xff] }
  0x2b   : > { %2533 = vmatprep.subr.mxu0 %v2731_v2 }
  0x2d   : > { %2510 = vmatmul.mubr.f32.vlgmr.msra.gmra.mxu0 %v2847_v11 }
  0x2e   : > { %2541 = vmatprep.mubr.msk.f32.mxu0 %vm2732_vm0, %v2731_v2  ;;  %2534 = vmatpush3.xpose.msra.mxu0 %v860_v31 }
  0x2f   : > { %2535 = vmatprep.subr.mxu0 %v2731_v2 }
  0x32   : > { %2536 = vmatpush3.xpose.msra.mxu0 %v859_v33 }
  0x33   : > { %2537 = vmatprep.subr.mxu0 %v2731_v2 }
  0x36   : > { %2538 = vmatpush3.xpose.msra.mxu0 %v858_v34  ;;  %v1467_v34 = vld [vmem:[%s3204_s5 + $0x58] sm:$0xff] }
  0x37   : > { %2539 = vmatprep.subr.mxu0 %v2731_v2 }
  0x3a   : > { %2540 = vmatpush3.xpose.msra.mxu0 %v857_v35  ;;  %v1466_v35 = vld [vmem:[%s3204_s5 + $0x50] sm:$0xff] }
  0x3b   : > { %2555 = vmatprep.subr.mxu0 %v2731_v2 }
  0x3d   : > { %2542 = vmatmul.mubr.f32.vlgmr.msra.gmra.mxu0 %v2847_v11 }
  0x3e   : > { %2557 = vmatprep.mubr.msk.f32.mxu0 %vm2732_vm0, %v2731_v2 }
  0xdc   : > { %v537_v12 = vpop.f32.mrf.mxu1  ;;  %v463_v13 = vpop.f32.mrf.mxu0 }
  0xdd   : > { %2513 = vmatpush3.xpose.msk.msra.mxu1 %vm615_vm1, %v537_v12 }
  0xde   : > { %v2500_v14 = vpop.f32.mrf.mxu1  ;;  %v2489_v15 = vpop.f32.mrf.mxu0  ;;  %2517 = vmatprep.subr.mxu1 %v2731_v2 }
  0xdf   : > { %v1169_v14 = vld [vmem:[%s3205_s6 + $0x38] sm:$0xff]  ;;  %v1168_v15 = vld [vmem:[%s3205_s6 + $0x30] sm:$0xff] }
  0xe0   : > { %2515 = vmatmul.mubr.msk.f32.vlgmr.msra.gmra.mxu1 %vm615_vm1, %v463_v13 }
  0xe1   : > { %2519 = vmatprep.mubr.msk.f32.mxu1 %vm2732_vm0, %v2731_v2 }
  0xed   : > { %v611_v30 = vpop.f32.mrf.mxu0 }
  0xee   : > { %2518 = vmatpush3.msra.mxu1 %v611_v30 }
  0xef   : > { %v2511_v32 = vpop.f32.mrf.mxu0  ;;  %2522 = vmatprep.subr.mxu1 %v2731_v2 }
  0xfd   : > { %v927_v51 = vpop.f32.mrf.mxu0 }
  0xfe   : > { %2556 = vmatpush3.xpose.msk.msra.mxu0 %vm615_vm1, %v927_v51 }
  0xff   : > { %v2543_v52 = vpop.f32.mrf.mxu0  ;;  %2560 = vmatprep.subr.mxu0 %v2731_v2 }
 0x100   : > { %v1702_v52 = vld [vmem:[%s3205_s6 + $0x58] sm:$0xff] }
 0x1a0   : > { %v688_v21 = vpop.f32.mrf.mxu1 }
 0x1a1   : > { %v693_v22 = vsel %vm692_vm2, -1e+09, %v688_v21  ;;  %v1390_v21 = vld [vmem:[%s3203_s4 + $0x40] sm:$0xff] }
 0x1a2   : > { %v2516_v23 = vpop.f32.mrf.mxu1  ;;  %v695_v24 = vsel %vm694_vm3, %v693_v22, -inf }
 0x1a3   : > { %696 = vmax.xlane.f32.xlu0 %v695_v24 }
 0x22c   : > { %v697_v25 = vpop.xlane.xlu0 %696 }
 0x22d   : > { %v698_v26 = vsub.f32 %v693_v22, %v697_v25  ;;  %v1319_v22 = vld [vmem:[%s3202_s3 + $0x58] sm:$0xff]  ;;  %v1318_v25 = vld [vmem:[%s3202_s3 + $0x50] sm:$0xff] }
 0x22f   : > { %v699_v27 = vmul.f32 1.442695, %v698_v26  ;;  %v1317_v26 = vld [vmem:[%s3202_s3 + $0x48] sm:$0xff] }
 0x231   : > { %2705 = vpow2.f32 %v699_v27  ;;  %v1316_v27 = vld [vmem:[%s3202_s3 + $0x40] sm:$0xff] }
 0x23e   : > { %v2706_v28 = vpop.eup %2705 }
 0x23f   : > { %v701_v29 = vsel %vm694_vm3, %v2706_v28, 0.0 }
 0x240   : > { %702 = vadd.xlane.f32.xlu0 %v701_v29 }
 0x2c9   : > { %v703_v36 = vpop.xlane.xlu0 %702 }
 0x2ca   : > { %2707 = vrcp.f32 %v703_v36  ;;  %v1465_v36 = vld [vmem:[%s3204_s5 + $0x48] sm:$0xff] }
 0x2d7   : > { %v2708_v37 = vpop.eup %2707 }
 0x2d8   : > { %v705_v38 = vmul.f32 %v2708_v37, %v2706_v28  ;;  %v1464_v37 = vld [vmem:[%s3204_s5 + $0x40] sm:$0xff] }
 0x2da   : > { %2520 = vmatmul.mubr.msk.f32.vlgmr.msra.gmra.mxu1 %vm694_vm3, %v705_v38 }
 0x2db   : > { %2523 = vmatpush3.xpose.msra.mxu1 %v786_v39  ;;  %2530 = vmatprep.mubr.msk.f32.mxu1 %vm2732_vm0, %v2731_v2 }
 0x2dc   : > { %2524 = vmatprep.subr.mxu1 %v2731_v2 }
 0x2df   : > { %2525 = vmatpush3.xpose.msra.mxu1 %v785_v40 }
 0x2e0   : > { %2526 = vmatprep.subr.mxu1 %v2731_v2 }
 0x2e3   : > { %2527 = vmatpush3.xpose.msra.mxu1 %v784_v41 }
 0x2e4   : > { %2528 = vmatprep.subr.mxu1 %v2731_v2 }
 0x2e7   : > { %2529 = vmatpush3.xpose.msra.mxu1 %v783_v42 }
 0x2e8   : > { %2544 = vmatprep.subr.mxu1 %v2731_v2 }
 0x2ea   : > { %2531 = vmatmul.mubr.f32.vlgmr.msra.gmra.mxu1 %v2845_v10 }
 0x2eb   : > { %2545 = vmatpush3.xpose.msra.mxu1 %v934_v43  ;;  %2552 = vmatprep.mubr.msk.f32.mxu1 %vm2732_vm0, %v2731_v2 }
 0x2ec   : > { %2546 = vmatprep.subr.mxu1 %v2731_v2 }
 0x2ef   : > { %2547 = vmatpush3.xpose.msra.mxu1 %v933_v44 }
 0x2f0   : > { %2548 = vmatprep.subr.mxu1 %v2731_v2 }
 0x2f3   : > { %2549 = vmatpush3.xpose.msra.mxu1 %v932_v45 }
 0x2f4   : > { %2550 = vmatprep.subr.mxu1 %v2731_v2 }
 0x2f7   : > { %2551 = vmatpush3.xpose.msra.mxu1 %v931_v46 }
 0x2f8   : > { %2576 = vmatprep.subr.mxu1 %v2731_v2 }
 0x2fa   : > { %2553 = vmatmul.mubr.f32.vlgmr.msra.gmra.mxu1 %v2847_v11 }
 0x2fb   : > { %2577 = vmatpush3.msra.mxu1 %v782_v47  ;;  %2584 = vmatprep.mubr.msk.f32.mxu1 %vm2732_vm0, %v2731_v2 }
 0x2fc   : > { %2578 = vmatprep.subr.mxu1 %v2731_v2 }
 0x2fd   : > { %2579 = vmatpush3.msra.mxu1 %v781_v48 }
 0x2fe   : > { %2580 = vmatprep.subr.mxu1 %v2731_v2 }
 0x2ff   : > { %2581 = vmatpush3.msra.mxu1 %v780_v49 }
 0x300   : > { %2582 = vmatprep.subr.mxu1 %v2731_v2 }
 0x301   : > { %2583 = vmatpush3.msra.mxu1 %v779_v50 }
 0x302   : > { %2598 = vmatprep.subr.mxu1 %v2731_v2 }
 0x39a   : > { %v775_v53 = vpop.f32.mrf.mxu1 }
 0x39b   : > { %2585 = vmatmul.mubr.msk.f32.vlgmr.msra.gmra.mxu1 %vm615_vm1, %v775_v53  ;;  %v1701_v53 = vld [vmem:[%s3205_s6 + $0x50] sm:$0xff] }
 0x39c   : > { %v2521_v54 = vpop.f32.mrf.mxu1  ;;  %2606 = vmatprep.mubr.msk.f32.mxu1 %vm2732_vm0, %v2731_v2  ;;  %2599 = vmatpush3.xpose.msra.mxu1 %v1393_v8 }
 0x39d   : > { %2600 = vmatprep.subr.mxu1 %v2731_v2  ;;  %v1700_v54 = vld [vmem:[%s3205_s6 + $0x48] sm:$0xff] }
 0x3a0   : > { %2601 = vmatpush3.xpose.msra.mxu1 %v1392_v18 }
 0x3a1   : > { %2602 = vmatprep.subr.mxu1 %v2731_v2 }
 0x3a4   : > { %2603 = vmatpush3.xpose.msra.mxu1 %v1391_v19 }
 0x3a5   : > { %2604 = vmatprep.subr.mxu1 %v2731_v2 }
 0x3a8   : > { %2605 = vmatpush3.xpose.msra.mxu1 %v1390_v21 }
 0x3a9   : > { %2620 = vmatprep.subr.mxu1 %v2731_v2 }
 0x3aa   : > { %v853_v55 = vpop.f32.mrf.mxu1 }
 0x3ab   : > { %2558 = vmatmul.mubr.msk.f32.vlgmr.msra.gmra.mxu0 %vm615_vm1, %v853_v55  ;;  %2607 = vmatmul.mubr.f32.vlgmr.msra.gmra.mxu1 %v2847_v11  ;;  %v1699_v55 = vld [vmem:[%s3205_s6 + $0x40] sm:$0xff] }
 0x3ac   : > { %v2532_v56 = vpop.f32.mrf.mxu1  ;;  %2562 = vmatprep.mubr.msk.f32.mxu0 %vm2732_vm0, %v2731_v2  ;;  %2622 = vmatprep.mubr.msk.f32.mxu1 %vm2732_vm0, %v2731_v2 }
 0x3ad   : > { %v1780_v56 = vld [vmem:[%s3202_s3 + $0x78] sm:$0xff] }
 0x3ba   : > { %v1001_v57 = vpop.f32.mrf.mxu1 }
 0x3bb   : > { %2561 = vmatpush3.msra.mxu0 %v1001_v57  ;;  %v1779_v57 = vld [vmem:[%s3202_s3 + $0x70] sm:$0xff] }
 0x3bc   : > { %v2554_v58 = vpop.f32.mrf.mxu1  ;;  %2565 = vmatprep.subr.mxu0 %v2731_v2 }
 0x3bd   : > { %v1778_v58 = vld [vmem:[%s3202_s3 + $0x68] sm:$0xff] }
 0x45b   : > { %v2978_v59 = vpop.f32.mrf.mxu1 }
 0x45d   : > { %v2586_v60 = vpop.f32.mrf.mxu1 }
 0x45e   : > { %v1777_v60 = vld [vmem:[%s3202_s3 + $0x60] sm:$0xff] }
 0x46b   : > { %v1077_v61 = vpop.f32.mrf.mxu0  ;;  %v1460_v28 = vpop.f32.mrf.mxu1 }
 0x46c   : > { %v1081_v62 = vsel %vm692_vm2, -1e+09, %v1077_v61  ;;  %2621 = vmatpush3.xpose.msk.msra.mxu1 %vm615_vm1, %v1460_v28  ;;  %v1854_v61 = vld [vmem:[%s3203_s4 + $0x78] sm:$0xff] }
 0x46d   : > { %v2559_v63 = vpop.f32.mrf.mxu0  ;;  %v1082_v0 = vsel %vm694_vm3, %v1081_v62, -inf  ;;  %v2608_v29 = vpop.f32.mrf.mxu1  ;;  %2625 = vmatprep.subr.mxu1 %v2731_v2 }
 0x46e   : > { %1083 = vmax.xlane.f32.xlu1 %v1082_v0  ;;  %v1852_v0 = vld [vmem:[%s3203_s4 + $0x68] sm:$0xff] }
 0x4f7   : > { %v1084_v1 = vpop.xlane.xlu1 %1083 }
 0x4f8   : > { %v1085_v3 = vsub.f32 %v1081_v62, %v1084_v1  ;;  %v1851_v1 = vld [vmem:[%s3203_s4 + $0x60] sm:$0xff] }
 0x4fa   : > { %v1086_v4 = vmul.f32 1.442695, %v1085_v3 }
 0x4fc   : > { %2709 = vpow2.f32 %v1086_v4 }
 0x509   : > { %v2710_v5 = vpop.eup %2709 }
 0x50a   : > { %v1088_v6 = vsel %vm694_vm3, %v2710_v5, 0.0 }
 0x50b   : > { %1089 = vadd.xlane.f32.xlu1 %v1088_v6 }
 0x594   : > { %v1090_v9 = vpop.xlane.xlu1 %1089 }
 0x595   : > { %2711 = vrcp.f32 %v1090_v9 }
 0x5a2   : > { %v2712_v12 = vpop.eup %2711 }
 0x5a3   : > { %v1092_v13 = vmul.f32 %v2712_v12, %v2710_v5 }
 0x5a5   : > { %2563 = vmatmul.mubr.msk.f32.vlgmr.msra.gmra.mxu0 %vm694_vm3, %v1092_v13 }
 0x5a6   : > { %2566 = vmatpush3.msra.mxu0 %v1169_v14  ;;  %2573 = vmatprep.mubr.msk.f32.mxu0 %vm2732_vm0, %v2731_v2  ;;  %v1928_v14 = vld [vmem:[%s3204_s5 + $0x78] sm:$0xff] }
 0x5a7   : > { %2567 = vmatprep.subr.mxu0 %v2731_v2 }
 0x5a8   : > { %2568 = vmatpush3.msra.mxu0 %v1168_v15  ;;  %v1926_v15 = vld [vmem:[%s3204_s5 + $0x68] sm:$0xff] }
 0x5a9   : > { %2569 = vmatprep.subr.mxu0 %v2731_v2 }
 0x5aa   : > { %2570 = vmatpush3.msra.mxu0 %v1167_v16  ;;  %v1925_v16 = vld [vmem:[%s3204_s5 + $0x60] sm:$0xff] }
 0x5ab   : > { %2571 = vmatprep.subr.mxu0 %v2731_v2 }
 0x5ac   : > { %2572 = vmatpush3.msra.mxu0 %v1166_v17 }
 0x5ad   : > { %2587 = vmatprep.subr.mxu0 %v2731_v2 }
 0x665   : > { %v1162_v23 = vpop.f32.mrf.mxu0 }
 0x666   : > { %2574 = vmatmul.mubr.msk.f32.vlgmr.msra.gmra.mxu0 %vm615_vm1, %v1162_v23 }
 0x667   : > { %2588 = vmatpush3.xpose.msra.mxu0 %v1319_v22  ;;  %v2564_v24 = vpop.f32.mrf.mxu0  ;;  %2595 = vmatprep.mubr.msk.f32.mxu0 %vm2732_vm0, %v2731_v2 }
 0x668   : > { %2589 = vmatprep.subr.mxu0 %v2731_v2 }
 0x66b   : > { %2590 = vmatpush3.xpose.msra.mxu0 %v1318_v25 }
 0x66c   : > { %2591 = vmatprep.subr.mxu0 %v2731_v2 }
 0x66f   : > { %2592 = vmatpush3.xpose.msra.mxu0 %v1317_v26 }
 0x670   : > { %2593 = vmatprep.subr.mxu0 %v2731_v2 }
 0x673   : > { %2594 = vmatpush3.xpose.msra.mxu0 %v1316_v27 }
 0x674   : > { %2609 = vmatprep.subr.mxu0 %v2731_v2 }
 0x676   : > { %2596 = vmatmul.mubr.f32.vlgmr.msra.gmra.mxu0 %v2845_v10 }
 0x677   : > { %2617 = vmatprep.mubr.msk.f32.mxu0 %vm2732_vm0, %v2731_v2  ;;  %2610 = vmatpush3.xpose.msra.mxu0 %v1467_v34 }
 0x678   : > { %2611 = vmatprep.subr.mxu0 %v2731_v2 }
 0x67b   : > { %2612 = vmatpush3.xpose.msra.mxu0 %v1466_v35 }
 0x67c   : > { %2613 = vmatprep.subr.mxu0 %v2731_v2 }
 0x67f   : > { %2614 = vmatpush3.xpose.msra.mxu0 %v1465_v36 }
 0x680   : > { %2615 = vmatprep.subr.mxu0 %v2731_v2 }
 0x683   : > { %2616 = vmatpush3.xpose.msra.mxu0 %v1464_v37  ;;  %v2378_v37 = vld [vmem:[%s3206_s7] ss:$0 sm:$0xff] }
 0x684   : > { %2641 = vmatprep.subr.mxu0 %v2731_v2 }
 0x686   : > { %2618 = vmatmul.mubr.f32.vlgmr.msra.gmra.mxu0 %v2847_v11 }
 0x687   : > { %2649 = vmatprep.mubr.msk.f32.mxu0 %vm2732_vm0, %v2731_v2  ;;  %2642 = vmatpush3.xpose.msra.mxu0 %v1780_v56 }
 0x688   : > { %2643 = vmatprep.subr.mxu0 %v2731_v2 }
 0x68b   : > { %2644 = vmatpush3.xpose.msra.mxu0 %v1779_v57 }
 0x68c   : > { %2645 = vmatprep.subr.mxu0 %v2731_v2 }
 0x68f   : > { %2646 = vmatpush3.xpose.msra.mxu0 %v1778_v58 }
 0x690   : > { %2647 = vmatprep.subr.mxu0 %v2731_v2 }
 0x693   : > { %2648 = vmatpush3.xpose.msra.mxu0 %v1777_v60 }
 0x694   : > { %2663 = vmatprep.subr.mxu0 %v2731_v2 }
 0x696   : > { %2650 = vmatmul.mubr.f32.vlgmr.msra.gmra.mxu0 %v2845_v10  ;;  %v1853_v10 = vld [vmem:[%s3203_s4 + $0x70] sm:$0xff] }
 0x697   : > { %2671 = vmatprep.mubr.msk.f32.mxu0 %vm2732_vm0, %v2731_v2  ;;  %2664 = vmatpush3.xpose.msra.mxu0 %v1928_v14 }
 0x698   : > { %2665 = vmatprep.subr.mxu0 %v2731_v2 }
 0x726   : > { %v3046_v30 = vpop.f32.mrf.mxu0 }
 0x727   : > { %v1313_v5 = vadd.f32 %v2978_v59, %v3046_v30  ;;  %v1927_v59 = vld [vmem:[%s3204_s5 + $0x70] sm:$0xff]  ;;  %v2163_v30 = vld [vmem:[%s3205_s6 + $0x78] sm:$0xff] }
 0x728   : > { %v2575_v31 = vpop.f32.mrf.mxu0  ;;  %2666 = vmatpush3.xpose.msra.mxu0 %v1927_v59 }
 0x729   : > { %2667 = vmatprep.subr.mxu0 %v2731_v2  ;;  %v2162_v31 = vld [vmem:[%s3205_s6 + $0x70] sm:$0xff] }
 0x72c   : > { %2668 = vmatpush3.xpose.msra.mxu0 %v1926_v15 }
 0x72d   : > { %2669 = vmatprep.subr.mxu0 %v2731_v2 }
 0x730   : > { %2670 = vmatpush3.xpose.msra.mxu0 %v1925_v16 }
 0x733   : > { %2672 = vmatmul.mubr.f32.vlgmr.msra.gmra.mxu0 %v2847_v11 }
 0x736   : > { %v1386_v32 = vpop.f32.mrf.mxu0 }
 0x737   : > { %2623 = vmatmul.mubr.msk.f32.vlgmr.msra.gmra.mxu1 %vm615_vm1, %v1386_v32  ;;  %v2161_v32 = vld [vmem:[%s3205_s6 + $0x68] sm:$0xff] }
 0x738   : > { %v2597_v33 = vpop.f32.mrf.mxu0  ;;  %2627 = vmatprep.mubr.msk.f32.mxu1 %vm2732_vm0, %v2731_v2 }
 0x739   : > { %v2160_v33 = vld [vmem:[%s3205_s6 + $0x60] sm:$0xff] }
 0x746   : > { %v1534_v47 = vpop.f32.mrf.mxu0 }
 0x747   : > { %2626 = vmatpush3.msra.mxu1 %v1534_v47 }
 0x748   : > { %v2619_v48 = vpop.f32.mrf.mxu0  ;;  %2630 = vmatprep.subr.mxu1 %v2731_v2 }
 0x756   : > { %v1847_v3 = vpop.f32.mrf.mxu0 }
 0x758   : > { %v2651_v4 = vpop.f32.mrf.mxu0 }
 0x7f3   : > { %v1995_v27 = vpop.f32.mrf.mxu0 }
 0x7f5   : > { %v2673_v28 = vpop.f32.mrf.mxu0 }
 0x7f7   : > { %v1610_v38 = vpop.f32.mrf.mxu1 }
 0x7f8   : > { %v1614_v39 = vsel %vm692_vm2, -1e+09, %v1610_v38 }
 0x7f9   : > { %v2624_v40 = vpop.f32.mrf.mxu1  ;;  %v1615_v41 = vsel %vm694_vm3, %v1614_v39, -inf }
 0x7fa   : > { %1616 = vmax.xlane.f32.xlu0 %v1615_v41 }
 0x883   : > { %v1617_v42 = vpop.xlane.xlu0 %1616 }
 0x884   : > { %v1618_v43 = vsub.f32 %v1614_v39, %v1617_v42 }
 0x886   : > { %v1619_v44 = vmul.f32 1.442695, %v1618_v43 }
 0x888   : > { %2713 = vpow2.f32 %v1619_v44 }
 0x895   : > { %v2714_v45 = vpop.eup %2713 }
 0x896   : > { %v1621_v46 = vsel %vm694_vm3, %v2714_v45, 0.0 }
 0x897   : > { %1622 = vadd.xlane.f32.xlu1 %v1621_v46 }
 0x920   : > { %v1623_v49 = vpop.xlane.xlu1 %1622 }
 0x921   : > { %2715 = vrcp.f32 %v1623_v49  ;;  %v2379_v49 = vld [vmem:[%s3207_s8] ss:$0 sm:$0xff] }
 0x92e   : > { %v2716_v50 = vpop.eup %2715 }
 0x92f   : > { %v1625_v51 = vmul.f32 %v2716_v50, %v2714_v45 }
 0x931   : > { %2628 = vmatmul.mubr.msk.f32.vlgmr.msra.gmra.mxu1 %vm694_vm3, %v1625_v51 }
 0x932   : > { %2631 = vmatpush3.msra.mxu1 %v1702_v52  ;;  %2638 = vmatprep.mubr.msk.f32.mxu1 %vm2732_vm0, %v2731_v2 }
 0x933   : > { %2632 = vmatprep.subr.mxu1 %v2731_v2 }
 0x934   : > { %2633 = vmatpush3.msra.mxu1 %v1701_v53 }
 0x935   : > { %2634 = vmatprep.subr.mxu1 %v2731_v2 }
 0x936   : > { %2635 = vmatpush3.msra.mxu1 %v1700_v54 }
 0x937   : > { %2636 = vmatprep.subr.mxu1 %v2731_v2 }
 0x938   : > { %2637 = vmatpush3.msra.mxu1 %v1699_v55 }
 0x939   : > { %2652 = vmatprep.subr.mxu1 %v2731_v2 }
 0x9f1   : > { %v1695_v62 = vpop.f32.mrf.mxu1 }
 0x9f2   : > { %2639 = vmatmul.mubr.msk.f32.vlgmr.msra.gmra.mxu1 %vm615_vm1, %v1695_v62 }
 0x9f3   : > { %2653 = vmatpush3.xpose.msra.mxu1 %v1854_v61  ;;  %v2629_v63 = vpop.f32.mrf.mxu1  ;;  %2660 = vmatprep.mubr.msk.f32.mxu1 %vm2732_vm0, %v2731_v2 }
 0x9f4   : > { %2654 = vmatprep.subr.mxu1 %v2731_v2 }
 0x9f7   : > { %2655 = vmatpush3.xpose.msra.mxu1 %v1853_v10 }
 0x9f8   : > { %2656 = vmatprep.subr.mxu1 %v2731_v2 }
 0x9fb   : > { %2657 = vmatpush3.xpose.msra.mxu1 %v1852_v0 }
 0x9fc   : > { %2658 = vmatprep.subr.mxu1 %v2731_v2 }
 0x9ff   : > { %2659 = vmatpush3.xpose.msra.mxu1 %v1851_v1 }
 0xa00   : > { %2674 = vmatprep.subr.mxu1 %v2731_v2 }
 0xa02   : > { %2661 = vmatmul.mubr.f32.vlgmr.msra.gmra.mxu1 %v2847_v11 }
 0xa03   : > { %2676 = vmatprep.mubr.msk.f32.mxu1 %vm2732_vm0, %v2731_v2 }
 0xab2   : > { %v1772_v6 = vpop.f32.mrf.mxu1 }
 0xab3   : > { %v1776_v8 = vadd.f32 %v1772_v6, %v1313_v5 }
 0xab4   : > { %v2640_v9 = vpop.f32.mrf.mxu1 }
 0xac2   : > { %v1921_v12 = vpop.f32.mrf.mxu1 }
 0xac3   : > { %2675 = vmatpush3.xpose.msk.msra.mxu1 %vm615_vm1, %v1921_v12 }
 0xac4   : > { %v2662_v13 = vpop.f32.mrf.mxu1  ;;  %2679 = vmatprep.subr.mxu1 %v2731_v2 }
 0xac6   : > { %2677 = vmatmul.mubr.msk.f32.vlgmr.msra.gmra.mxu1 %vm615_vm1, %v1847_v3 }
 0xac7   : > { %2681 = vmatprep.mubr.msk.f32.mxu1 %vm2732_vm0, %v2731_v2  ;;  %2680 = vmatpush3.msra.mxu1 %v1995_v27 }
 0xac8   : > { %2684 = vmatprep.subr.mxu1 %v2731_v2 }
 0xb86   : > { %v2071_v17 = vpop.f32.mrf.mxu1 }
 0xb87   : > { %v2075_v18 = vsel %vm692_vm2, -1e+09, %v2071_v17 }
 0xb88   : > { %v2678_v19 = vpop.f32.mrf.mxu1  ;;  %v2076_v21 = vsel %vm694_vm3, %v2075_v18, -inf }
 0xb89   : > { %2077 = vmax.xlane.f32.xlu0 %v2076_v21 }
 0xc12   : > { %v2078_v22 = vpop.xlane.xlu0 %2077 }
 0xc13   : > { %v2079_v23 = vsub.f32 %v2075_v18, %v2078_v22 }
 0xc15   : > { %v2080_v24 = vmul.f32 1.442695, %v2079_v23 }
 0xc17   : > { %2717 = vpow2.f32 %v2080_v24 }
 0xc24   : > { %v2718_v25 = vpop.eup %2717 }
 0xc25   : > { %v2082_v26 = vsel %vm694_vm3, %v2718_v25, 0.0 }
 0xc26   : > { %2083 = vadd.xlane.f32.xlu1 %v2082_v26 }
 0xcaf   : > { %v2084_v11 = vpop.xlane.xlu1 %2083 }
 0xcb0   : > { %2719 = vrcp.f32 %v2084_v11 }
 0xcbd   : > { %v2720_v20 = vpop.eup %2719 }
 0xcbe   : > { %v2086_v29 = vmul.f32 %v2720_v20, %v2718_v25 }
 0xcc0   : > { %2682 = vmatmul.mubr.msk.f32.vlgmr.msra.gmra.mxu1 %vm694_vm3, %v2086_v29 }
 0xcc1   : > { %2685 = vmatpush3.msra.mxu1 %v2163_v30  ;;  %2692 = vmatprep.mubr.msk.f32.mxu1 %vm2732_vm0, %v2731_v2 }
 0xcc2   : > { %2686 = vmatprep.subr.mxu1 %v2731_v2 }
 0xcc3   : > { %2687 = vmatpush3.msra.mxu1 %v2162_v31 }
 0xcc4   : > { %2688 = vmatprep.subr.mxu1 %v2731_v2 }
 0xcc5   : > { %2689 = vmatpush3.msra.mxu1 %v2161_v32 }
 0xcc6   : > { %2690 = vmatprep.subr.mxu1 %v2731_v2 }
 0xcc7   : > { %2691 = vmatpush3.msra.mxu1 %v2160_v33 }
 0xd80   : > { %v2156_v34 = vpop.f32.mrf.mxu1 }
 0xd81   : > { %2693 = vmatmul.mubr.msk.f32.vlgmr.msra.gmra.mxu1 %vm615_vm1, %v2156_v34 }
 0xd82   : > { %v2683_v35 = vpop.f32.mrf.mxu1 }
 0xe41   : > { %v2233_v36 = vpop.f32.mrf.mxu1 }
 0xe42   : > { %v2237_v38 = vadd.f32 %v2233_v36, %v1776_v8 }
 0xe43   : > { %v2694_v39 = vpop.f32.mrf.mxu1 }
 0xe44   : > { %v2245_v40 = vadd.f32 %v2378_v37, %v2237_v38 }
 0xe46   : > { %v2246_v41 = vadd.f32 %v2245_v40, %v2830_v7  ;;  %v2380_v7 = vld [vmem:[%s3208_s9] ss:$0 sm:$0xff] }
 0xe48   : > { %2249 = vadd.xlane.f32.xlu0 %v2246_v41 }
 0xed1   : > { %v2250_v2 = vpop.xlane.xlu0 %2249 }
 0xed2   : > { %v2252_v42 = vmul.f32 0.0078125, %v2250_v2 }
 0xed4   : > { %v2253_v43 = vsub.f32 %v2246_v41, %v2252_v42 }
 0xed6   : > { %v2254_v44 = vmul.f32 %v2253_v43, %v2253_v43 }
 0xed8   : > { %2255 = vadd.xlane.f32.xlu1 %v2254_v44 }
 0xf61   : > { %v2256_v45 = vpop.xlane.xlu1 %2255 }
 0xf62   : > { %v2257_v46 = vmul.f32 0.0078125, %v2256_v45 }
 0xf64   : > { %v2258_v47 = vadd.f32 1e-05, %v2257_v46 }
 0xf66   : > { %2721 = vrsqrt.f32 %v2258_v47 }
 0xf73   : > { %v2722_v48 = vpop.eup %2721 }
 0xf74   : > { %v2260_v50 = vmul.f32 %v2722_v48, %v2253_v43 }
 0xf76   : > { %v2267_v51 = vmul.f32 %v2379_v49, %v2260_v50 }
 0xf78   : > { %v2274_v52 = vadd.f32 %v2380_v7, %v2267_v51 }
 0xf7a   : > { %2275 = vst [vmem:[%s388_s16] sm:$0xff] %v2274_v52 }
 0xf7b PF: > { %s20_s13 = sadd.s32 1, %s2729_s13  }
 0xf7c   : > { %p17_p4 = scmp.ge.s32.totalorder %s20_s13, 4  }
 0xf7e   :  { %19 = sbr.rel (!%p17_p4) target bundleno = 1 (0x1), region = 96 }

</bundles_post_ra>
